<compile_context>
chip_gen: v6e
topology: v6e:2x2x1
jax: 0.10.0
libtpu: 0.0.40
codegen_flags: <defaults>
</compile_context>

<pallas_src>
import functools

import jax
import jax.numpy as jnp
from jax import lax
from jax.experimental import pallas as pl
from jax.experimental.pallas import tpu as pltpu

_NEG = -1e30   # fill for masked-out entries of the hard-positive max
_POS = 1e30    # fill for masked-out entries of the hard-negative min


def _round_up(x, m):
    return ((x + m - 1) // m) * m


def _cross_triplet_kernel(xr_ref, xc_ref, sqr_ref, sqc_ref,
                          tr_ref, tc_ref, sr_ref, sc_ref, vc_ref,
                          loss_ref, ap_ref, an_ref, prec_ref,
                          ap2_acc, an2_acc, *, margin):
    """One (row_block i, col_block j) grid step.

    xr_ref : (bm, d)  query rows of x            (constant across j, not re-DMA'd)
    xc_ref : (bn, d)  candidate rows of x        (varies with j, double-buffered)
    sqr_ref: (1, bm)  ||x_i||^2, lane-dense      (constant across j)
    sqc_ref: (bn, 1)  ||x_j||^2
    tr/tc, sr/sc: labels / modality ids, row- and column-oriented
    vc_ref : (bn, 1)  1 for real candidates, 0 for batch padding
    outputs: lane-dense (1, bm) per-row hinge loss / dist_ap / dist_an / prec
    scratch: running max / min of (partial) squared distances, (1, bm) f32
    """
    j = pl.program_id(1)
    nj = pl.num_programs(1)

    @pl.when(j == 0)
    def _init():
        ap2_acc[...] = jnp.full(ap2_acc.shape, _NEG, jnp.float32)
        an2_acc[...] = jnp.full(an2_acc.shape, _POS, jnp.float32)

    xr = xr_ref[...]                              # (bm, d), native dtype (f32 or bf16)
    xc = xc_ref[...]                              # (bn, d)

    # Gram^T block: (bn, bm) = xc @ xr^T, expressed as a contraction over the feature dim of
    # both operands so no transposed copy is materialized; accumulate in f32 on the MXU.
    gram_t = lax.dot_general(xc, xr, (((1,), (1,)), ((), ())),
                             preferred_element_type=jnp.float32)

    # Partial squared distance.  ||x_i||^2 is constant along the reduction (candidate) axis,
    # so it is added at finalize only — it cannot change the argmax/argmin.
    part = sqc_ref[...] - 2.0 * gram_t            # (bn, bm) f32

    same = tc_ref[...] == tr_ref[...]                         # same identity
    cross = jnp.logical_and(sc_ref[...] != sr_ref[...],       # different modality ...
                            vc_ref[...] > 0)                  # ... and a real (non-pad) candidate
    mask1 = jnp.logical_and(same, cross)                      # cross-modal positives
    mask2 = jnp.logical_and(jnp.logical_not(same), cross)     # cross-modal negatives

    blk_max = jnp.max(jnp.where(mask1, part, _NEG), axis=0, keepdims=True)   # (1, bm)
    blk_min = jnp.min(jnp.where(mask2, part, _POS), axis=0, keepdims=True)   # (1, bm)
    ap2_acc[...] = jnp.maximum(ap2_acc[...], blk_max)
    an2_acc[...] = jnp.minimum(an2_acc[...], blk_min)

    @pl.when(j == nj - 1)
    def _finalize():
        sq_r = sqr_ref[...]                                        # (1, bm)
        dist_ap = jnp.sqrt(jnp.maximum(ap2_acc[...] + sq_r, 1e-12))
        dist_an = jnp.sqrt(jnp.maximum(an2_acc[...] + sq_r, 1e-12))
        ap_ref[...] = dist_ap
        an_ref[...] = dist_an
        # MarginRankingLoss(y=1) per-row hinge; the mean over the batch is done in the wrapper
        # (the row-block axis is "parallel", so no cross-block accumulation in-kernel).
        loss_ref[...] = jnp.maximum(dist_ap - dist_an + jnp.float32(margin), 0.0)
        prec_ref[...] = (dist_an > dist_ap).astype(jnp.int32)


def cross_triplet(inputs, targets, sub, margin=0.0, block=256):
    """inputs: (n, d) float32/bfloat16, targets: (n,) int, sub: (n,) int (modality id).

    Returns (loss scalar f32, prec (n,) bool, dist_ap (n,), dist_an (n,)), matching the
    PyTorch module's forward (loss, prec) plus the two debug vectors.
    """
    n, d = inputs.shape

    # Pad the batch so both grid axes tile evenly.  `block` should be a multiple of 128
    # (256 fits comfortably in VMEM on v5e/v6e/v7x even with double-buffering).
    n_pad = _round_up(n, 128)
    bm = bn = min(block, n_pad)
    n_pad = _round_up(n_pad, bm)

    x_pad = jnp.pad(inputs, ((0, n_pad - n), (0, 0)))
    t_pad = jnp.pad(targets.astype(jnp.int32), (0, n_pad - n), constant_values=-1)
    s_pad = jnp.pad(sub.astype(jnp.int32), (0, n_pad - n), constant_values=-1)
    valid = (jnp.arange(n_pad) < n).astype(jnp.int32)

    # ||x||^2 once, in f32, supplied in both orientations (layout plumbing, not hot compute).
    sq = jnp.sum(x_pad.astype(jnp.float32) ** 2, axis=1)
    sq_row, sq_col = sq.reshape(1, n_pad), sq.reshape(n_pad, 1)
    t_row, t_col = t_pad.reshape(1, n_pad), t_pad.reshape(n_pad, 1)
    s_row, s_col = s_pad.reshape(1, n_pad), s_pad.reshape(n_pad, 1)
    v_col = valid.reshape(n_pad, 1)

    grid = (n_pad // bm, n_pad // bn)
    kernel = functools.partial(_cross_triplet_kernel, margin=float(margin))

    row_vec = lambda dt: jax.ShapeDtypeStruct((1, n_pad), dt)
    out_shapes = (row_vec(jnp.float32),   # per-row hinge loss
                  row_vec(jnp.float32),   # dist_ap
                  row_vec(jnp.float32),   # dist_an
                  row_vec(jnp.int32))     # prec

    cost = pl.CostEstimate(
        flops=int(2 * n_pad * n_pad * d),
        transcendentals=int(2 * n_pad),
        bytes_accessed=int(x_pad.size * x_pad.dtype.itemsize * (1 + grid[0])
                           + 12 * n_pad * 4))

    row_block = pl.BlockSpec((1, bm), lambda i, j: (0, i))   # lane-dense, per row block
    col_block = pl.BlockSpec((bn, 1), lambda i, j: (j, 0))   # per candidate block

    loss_vec, dist_ap, dist_an, prec = pl.pallas_call(
        kernel,
        out_shape=out_shapes,
        grid=grid,
        in_specs=[
            pl.BlockSpec((bm, d), lambda i, j: (i, 0)),      # x query rows (constant over j)
            pl.BlockSpec((bn, d), lambda i, j: (j, 0)),      # x candidate rows
            row_block,                                       # ||x_i||^2
            col_block,                                       # ||x_j||^2
            row_block,                                       # targets (rows)
            col_block,                                       # targets (cols)
            row_block,                                       # sub (rows)
            col_block,                                       # sub (cols)
            col_block,                                       # valid (cols)
        ],
        out_specs=(row_block, row_block, row_block, row_block),
        scratch_shapes=[pltpu.VMEM((1, bm), jnp.float32),    # running max (squared, partial)
                        pltpu.VMEM((1, bm), jnp.float32)],   # running min (squared, partial)
        compiler_params=pltpu.CompilerParams(
            dimension_semantics=("parallel", "arbitrary")),
        cost_estimate=cost,
    )(x_pad, x_pad, sq_row, sq_col, t_row, t_col, s_row, s_col, v_col)

    loss = jnp.mean(loss_vec[0, :n])
    return loss, prec[0, :n].astype(jnp.bool_), dist_ap[0, :n], dist_an[0, :n]


def _reference(inputs, targets, sub, margin=0.0):
    # Pure-JAX reference mirroring the PyTorch forward.
    inputs = inputs.astype(jnp.float32)
    sq = jnp.sum(inputs ** 2, axis=1, keepdims=True)
    dist = sq + sq.T - 2.0 * (inputs @ inputs.T)
    dist = jnp.sqrt(jnp.clip(dist, 1e-12))
    same = targets[:, None] == targets[None, :]
    diff_sub = sub[:, None] != sub[None, :]
    mask1 = same & diff_sub
    mask2 = (~same) & diff_sub
    dist_ap = jnp.max(jnp.where(mask1, dist, -1e30), axis=1)
    dist_an = jnp.min(jnp.where(mask2, dist, 1e30), axis=1)
    loss = jnp.mean(jnp.maximum(dist_ap - dist_an + margin, 0.0))
    prec = dist_an > dist_ap
    return loss, prec, dist_ap, dist_an


def _check(inputs, targets, sub, margin):
    loss, prec, dist_ap, dist_an = cross_triplet(inputs, targets, sub, margin=margin)
    jax.block_until_ready((loss, prec, dist_ap, dist_an))
    ref_loss, ref_prec, ref_ap, ref_an = _reference(inputs, targets, sub, margin=margin)
    assert jnp.allclose(loss, ref_loss, rtol=1e-4, atol=1e-4), (loss, ref_loss)
    assert jnp.allclose(dist_ap, ref_ap, rtol=1e-4, atol=1e-4)
    assert jnp.allclose(dist_an, ref_an, rtol=1e-4, atol=1e-4)
    assert bool(jnp.all(prec == ref_prec))


if __name__ == "__main__":
    key = jax.random.PRNGKey(0)

    # Small case: two identities, two modalities ("sub") — every sample has cross-modal
    # positives and negatives, as the PyTorch loop assumes.
    n, d = 8, 32
    k1, k2 = jax.random.split(key)
    inputs = jax.random.normal(k1, (n, d), dtype=jnp.float32)
    targets = jnp.array([0, 0, 1, 1, 0, 0, 1, 1], dtype=jnp.int32)
    sub = jnp.array([0, 0, 0, 0, 1, 1, 1, 1], dtype=jnp.int32)
    _check(inputs, targets, sub, margin=0.0)
    _check(inputs, targets, sub, margin=0.3)

    # A non-aligned batch exercising the padding / valid-mask path.
    n2, d2 = 20, 64
    inputs2 = jax.random.normal(k2, (n2, d2), dtype=jnp.float32)
    targets2 = jnp.concatenate([jnp.arange(10) % 5, jnp.arange(10) % 5]).astype(jnp.int32)
    sub2 = jnp.concatenate([jnp.zeros(10), jnp.ones(10)]).astype(jnp.int32)
    _check(inputs2, targets2, sub2, margin=0.3)

    print("KERNEL_OK")
</pallas_src>

<mosaic_0001>
module attributes {stable_mosaic.version = 11 : i64} {
  func.func @_cross_triplet_kernel(%arg0: i32, %arg1: i32, %arg2: memref<128x32xf32, #tpu.memory_space<vmem>>, %arg3: memref<128x32xf32, #tpu.memory_space<vmem>>, %arg4: memref<1x128xf32, #tpu.memory_space<vmem>>, %arg5: memref<128x1xf32, #tpu.memory_space<vmem>>, %arg6: memref<1x128xi32, #tpu.memory_space<vmem>>, %arg7: memref<128x1xi32, #tpu.memory_space<vmem>>, %arg8: memref<1x128xi32, #tpu.memory_space<vmem>>, %arg9: memref<128x1xi32, #tpu.memory_space<vmem>>, %arg10: memref<128x1xi32, #tpu.memory_space<vmem>>, %arg11: memref<1x128xf32, #tpu.memory_space<vmem>>, %arg12: memref<1x128xf32, #tpu.memory_space<vmem>>, %arg13: memref<1x128xf32, #tpu.memory_space<vmem>>, %arg14: memref<1x128xi32, #tpu.memory_space<vmem>>, %arg15: memref<1x128xf32, #tpu.memory_space<vmem>>, %arg16: memref<1x128xf32, #tpu.memory_space<vmem>>) attributes {dimension_semantics = [#tpu.dimension_semantics<parallel>, #tpu.dimension_semantics<arbitrary>], iteration_bounds = array<i64: 1, 1>, scalar_prefetch = 0 : i64, scratch_operands = 2 : i64, tpu.core_type = #tpu.core_type<tc>, window_params = [{transform_indices = @transform_0, window_bounds = array<i64: 128, 32>}, {transform_indices = @transform_1, window_bounds = array<i64: 128, 32>}, {transform_indices = @transform_2, window_bounds = array<i64: 1, 128>}, {transform_indices = @transform_3, window_bounds = array<i64: 128, 1>}, {transform_indices = @transform_4, window_bounds = array<i64: 1, 128>}, {transform_indices = @transform_5, window_bounds = array<i64: 128, 1>}, {transform_indices = @transform_6, window_bounds = array<i64: 1, 128>}, {transform_indices = @transform_7, window_bounds = array<i64: 128, 1>}, {transform_indices = @transform_8, window_bounds = array<i64: 128, 1>}, {transform_indices = @transform_9, window_bounds = array<i64: 1, 128>}, {transform_indices = @transform_10, window_bounds = array<i64: 1, 128>}, {transform_indices = @transform_11, window_bounds = array<i64: 1, 128>}, {transform_indices = @transform_12, window_bounds = array<i64: 1, 128>}]} {
    %c0_i32 = arith.constant 0 : i32
    %0 = arith.cmpi eq, %arg1, %c0_i32 : i32
    %1 = arith.extui %0 : i1 to i32
    %c0_i32_0 = arith.constant 0 : i32
    %2 = arith.cmpi ne, %1, %c0_i32_0 : i32
    scf.if %2 {
      %cst_33 = arith.constant -1.000000e+30 : f32
      %46 = vector.broadcast %cst_33 : f32 to vector<1x128xf32>
      %c0_34 = arith.constant 0 : index
      %c0_35 = arith.constant 0 : index
      %47 = vector.load %arg15[%c0_34, %c0_35] : memref<1x128xf32, #tpu.memory_space<vmem>>, vector<1x128xf32>
      tpu.vector_store %arg15[%c0_34, %c0_35], %46 {strides = array<i32>} : memref<1x128xf32, #tpu.memory_space<vmem>>, vector<1x128xf32>,
      %cst_36 = arith.constant 1.000000e+30 : f32
      %48 = vector.broadcast %cst_36 : f32 to vector<1x128xf32>
      %c0_37 = arith.constant 0 : index
      %c0_38 = arith.constant 0 : index
      %49 = vector.load %arg16[%c0_37, %c0_38] : memref<1x128xf32, #tpu.memory_space<vmem>>, vector<1x128xf32>
      tpu.vector_store %arg16[%c0_37, %c0_38], %48 {strides = array<i32>} : memref<1x128xf32, #tpu.memory_space<vmem>>, vector<1x128xf32>,
    } else {
    }
    %c0 = arith.constant 0 : index
    %c0_1 = arith.constant 0 : index
    %3 = vector.load %arg2[%c0, %c0_1] : memref<128x32xf32, #tpu.memory_space<vmem>>, vector<128x32xf32>
    %c0_2 = arith.constant 0 : index
    %c0_3 = arith.constant 0 : index
    %4 = vector.load %arg3[%c0_2, %c0_3] : memref<128x32xf32, #tpu.memory_space<vmem>>, vector<128x32xf32>
    %cst = arith.constant dense<0.000000e+00> : vector<128x128xf32>
    %5 = tpu.matmul %4, %3, %cst {dimension_numbers = #tpu.dot_dimension_numbers<[1], [1], [0], [0], [0, 0, 1, 0], [], []>} : vector<128x32xf32>, vector<128x32xf32>, vector<128x128xf32> -> vector<128x128xf32>
    %c0_4 = arith.constant 0 : index
    %c0_5 = arith.constant 0 : index
    %6 = vector.load %arg5[%c0_4, %c0_5] : memref<128x1xf32, #tpu.memory_space<vmem>>, vector<128x1xf32>
    %cst_6 = arith.constant 2.000000e+00 : f32
    %7 = vector.broadcast %cst_6 : f32 to vector<128x128xf32>
    %8 = arith.mulf %7, %5 : vector<128x128xf32>
    %9 = vector.broadcast %6 : vector<128x1xf32> to vector<128x128xf32>
    %10 = arith.subf %9, %8 : vector<128x128xf32>
    %c0_7 = arith.constant 0 : index
    %c0_8 = arith.constant 0 : index
    %11 = vector.load %arg7[%c0_7, %c0_8] : memref<128x1xi32, #tpu.memory_space<vmem>>, vector<128x1xi32>
    %c0_9 = arith.constant 0 : index
    %c0_10 = arith.constant 0 : index
    %12 = vector.load %arg6[%c0_9, %c0_10] : memref<1x128xi32, #tpu.memory_space<vmem>>, vector<1x128xi32>
    %13 = vector.broadcast %11 : vector<128x1xi32> to vector<128x128xi32>
    %14 = vector.broadcast %12 : vector<1x128xi32> to vector<128x128xi32>
    %15 = arith.cmpi eq, %13, %14 : vector<128x128xi32>
    %c0_11 = arith.constant 0 : index
    %c0_12 = arith.constant 0 : index
    %16 = vector.load %arg9[%c0_11, %c0_12] : memref<128x1xi32, #tpu.memory_space<vmem>>, vector<128x1xi32>
    %c0_13 = arith.constant 0 : index
    %c0_14 = arith.constant 0 : index
    %17 = vector.load %arg8[%c0_13, %c0_14] : memref<1x128xi32, #tpu.memory_space<vmem>>, vector<1x128xi32>
    %18 = vector.broadcast %16 : vector<128x1xi32> to vector<128x128xi32>
    %19 = vector.broadcast %17 : vector<1x128xi32> to vector<128x128xi32>
    %20 = arith.cmpi ne, %18, %19 : vector<128x128xi32>
    %c0_15 = arith.constant 0 : index
    %c0_16 = arith.constant 0 : index
    %21 = vector.load %arg10[%c0_15, %c0_16] : memref<128x1xi32, #tpu.memory_space<vmem>>, vector<128x1xi32>
    %c0_i32_17 = arith.constant 0 : i32
    %22 = vector.broadcast %c0_i32_17 : i32 to vector<128x1xi32>
    %23 = arith.cmpi sgt, %21, %22 : vector<128x1xi32>
    %24 = vector.broadcast %23 : vector<128x1xi1> to vector<128x128xi1>
    %25 = arith.andi %20, %24 : vector<128x128xi1>
    %26 = arith.andi %15, %25 : vector<128x128xi1>
    %cst_18 = arith.constant dense<true> : vector<128x128xi1>
    %27 = arith.xori %15, %cst_18 : vector<128x128xi1>
    %28 = arith.andi %27, %25 : vector<128x128xi1>
    %cst_19 = arith.constant -1.000000e+30 : f32
    %29 = vector.broadcast %cst_19 : f32 to vector<128x128xf32>
    %30 = arith.select %26, %10, %29 : vector<128x128xi1>, vector<128x128xf32>
    %cst_20 = arith.constant dense<0xFF800000> : vector<128xf32>
    %31 = vector.multi_reduction <maximumf>, %30, %cst_20 [0] : vector<128x128xf32> to vector<128xf32>
    %32 = vector.shape_cast %31 : vector<128xf32> to vector<1x128xf32>
    %cst_21 = arith.constant 1.000000e+30 : f32
    %33 = vector.broadcast %cst_21 : f32 to vector<128x128xf32>
    %34 = arith.select %28, %10, %33 : vector<128x128xi1>, vector<128x128xf32>
    %cst_22 = arith.constant dense<0x7F800000> : vector<128xf32>
    %35 = vector.multi_reduction <minimumf>, %34, %cst_22 [0] : vector<128x128xf32> to vector<128xf32>
    %36 = vector.shape_cast %35 : vector<128xf32> to vector<1x128xf32>
    %c0_23 = arith.constant 0 : index
    %c0_24 = arith.constant 0 : index
    %37 = vector.load %arg15[%c0_23, %c0_24] : memref<1x128xf32, #tpu.memory_space<vmem>>, vector<1x128xf32>
    %38 = arith.maximumf %37, %32 : vector<1x128xf32>
    %c0_25 = arith.constant 0 : index
    %c0_26 = arith.constant 0 : index
    %39 = vector.load %arg15[%c0_25, %c0_26] : memref<1x128xf32, #tpu.memory_space<vmem>>, vector<1x128xf32>
    tpu.vector_store %arg15[%c0_25, %c0_26], %38 {strides = array<i32>} : memref<1x128xf32, #tpu.memory_space<vmem>>, vector<1x128xf32>,
    %c0_27 = arith.constant 0 : index
    %c0_28 = arith.constant 0 : index
    %40 = vector.load %arg16[%c0_27, %c0_28] : memref<1x128xf32, #tpu.memory_space<vmem>>, vector<1x128xf32>
    %41 = arith.minimumf %40, %36 : vector<1x128xf32>
    %c0_29 = arith.constant 0 : index
    %c0_30 = arith.constant 0 : index
    %42 = vector.load %arg16[%c0_29, %c0_30] : memref<1x128xf32, #tpu.memory_space<vmem>>, vector<1x128xf32>
    tpu.vector_store %arg16[%c0_29, %c0_30], %41 {strides = array<i32>} : memref<1x128xf32, #tpu.memory_space<vmem>>, vector<1x128xf32>,
    %c0_i32_31 = arith.constant 0 : i32
    %43 = arith.cmpi eq, %arg1, %c0_i32_31 : i32
    %44 = arith.extui %43 : i1 to i32
    %c0_i32_32 = arith.constant 0 : i32
    %45 = arith.cmpi ne, %44, %c0_i32_32 : i32
    scf.if %45 {
      %c0_33 = arith.constant 0 : index
      %c0_34 = arith.constant 0 : index
      %46 = vector.load %arg4[%c0_33, %c0_34] : memref<1x128xf32, #tpu.memory_space<vmem>>, vector<1x128xf32>
      %c0_35 = arith.constant 0 : index
      %c0_36 = arith.constant 0 : index
      %47 = vector.load %arg15[%c0_35, %c0_36] : memref<1x128xf32, #tpu.memory_space<vmem>>, vector<1x128xf32>
      %48 = arith.addf %47, %46 : vector<1x128xf32>
      %cst_37 = arith.constant 9.99999996E-13 : f32
      %49 = vector.broadcast %cst_37 : f32 to vector<1x128xf32>
      %50 = arith.maximumf %48, %49 : vector<1x128xf32>
      %51 = math.sqrt %50 : vector<1x128xf32>
      %c0_38 = arith.constant 0 : index
      %c0_39 = arith.constant 0 : index
      %52 = vector.load %arg16[%c0_38, %c0_39] : memref<1x128xf32, #tpu.memory_space<vmem>>, vector<1x128xf32>
      %53 = arith.addf %52, %46 : vector<1x128xf32>
      %cst_40 = arith.constant 9.99999996E-13 : f32
      %54 = vector.broadcast %cst_40 : f32 to vector<1x128xf32>
      %55 = arith.maximumf %53, %54 : vector<1x128xf32>
      %56 = math.sqrt %55 : vector<1x128xf32>
      %c0_41 = arith.constant 0 : index
      %c0_42 = arith.constant 0 : index
      %57 = vector.load %arg12[%c0_41, %c0_42] : memref<1x128xf32, #tpu.memory_space<vmem>>, vector<1x128xf32>
      tpu.vector_store %arg12[%c0_41, %c0_42], %51 {strides = array<i32>} : memref<1x128xf32, #tpu.memory_space<vmem>>, vector<1x128xf32>,
      %c0_43 = arith.constant 0 : index
      %c0_44 = arith.constant 0 : index
      %58 = vector.load %arg13[%c0_43, %c0_44] : memref<1x128xf32, #tpu.memory_space<vmem>>, vector<1x128xf32>
      tpu.vector_store %arg13[%c0_43, %c0_44], %56 {strides = array<i32>} : memref<1x128xf32, #tpu.memory_space<vmem>>, vector<1x128xf32>,
      %59 = arith.subf %51, %56 : vector<1x128xf32>
      %cst_45 = arith.constant 0.000000e+00 : f32
      %60 = vector.broadcast %cst_45 : f32 to vector<1x128xf32>
      %61 = arith.addf %59, %60 : vector<1x128xf32>
      %cst_46 = arith.constant 0.000000e+00 : f32
      %62 = vector.broadcast %cst_46 : f32 to vector<1x128xf32>
      %63 = arith.maximumf %61, %62 : vector<1x128xf32>
      %c0_47 = arith.constant 0 : index
      %c0_48 = arith.constant 0 : index
      %64 = vector.load %arg11[%c0_47, %c0_48] : memref<1x128xf32, #tpu.memory_space<vmem>>, vector<1x128xf32>
      tpu.vector_store %arg11[%c0_47, %c0_48], %63 {strides = array<i32>} : memref<1x128xf32, #tpu.memory_space<vmem>>, vector<1x128xf32>,
      %65 = arith.cmpf ogt, %56, %51 : vector<1x128xf32>
      %66 = arith.extui %65 : vector<1x128xi1> to vector<1x128xi32>
      %c0_49 = arith.constant 0 : index
      %c0_50 = arith.constant 0 : index
      %67 = vector.load %arg14[%c0_49, %c0_50] : memref<1x128xi32, #tpu.memory_space<vmem>>, vector<1x128xi32>
      tpu.vector_store %arg14[%c0_49, %c0_50], %66 {strides = array<i32>} : memref<1x128xi32, #tpu.memory_space<vmem>>, vector<1x128xi32>,
    } else {
    }
    return
  }
  func.func @transform_0(%arg0: i32, %arg1: i32) -> (i32, i32) {
    %c0_i32 = arith.constant 0 : i32
    %c0_i32_0 = arith.constant 0 : i32
    return %arg0, %c0_i32 : i32, i32
  }
  func.func @transform_1(%arg0: i32, %arg1: i32) -> (i32, i32) {
    %c0_i32 = arith.constant 0 : i32
    %c0_i32_0 = arith.constant 0 : i32
    return %arg1, %c0_i32 : i32, i32
  }
  func.func @transform_2(%arg0: i32, %arg1: i32) -> (i32, i32) {
    %c0_i32 = arith.constant 0 : i32
    %c0_i32_0 = arith.constant 0 : i32
    return %c0_i32, %arg0 : i32, i32
  }
  func.func @transform_3(%arg0: i32, %arg1: i32) -> (i32, i32) {
    %c0_i32 = arith.constant 0 : i32
    %c0_i32_0 = arith.constant 0 : i32
    return %arg1, %c0_i32 : i32, i32
  }
  func.func @transform_4(%arg0: i32, %arg1: i32) -> (i32, i32) {
    %c0_i32 = arith.constant 0 : i32
    %c0_i32_0 = arith.constant 0 : i32
    return %c0_i32, %arg0 : i32, i32
  }
  func.func @transform_5(%arg0: i32, %arg1: i32) -> (i32, i32) {
    %c0_i32 = arith.constant 0 : i32
    %c0_i32_0 = arith.constant 0 : i32
    return %arg1, %c0_i32 : i32, i32
  }
  func.func @transform_6(%arg0: i32, %arg1: i32) -> (i32, i32) {
    %c0_i32 = arith.constant 0 : i32
    %c0_i32_0 = arith.constant 0 : i32
    return %c0_i32, %arg0 : i32, i32
  }
  func.func @transform_7(%arg0: i32, %arg1: i32) -> (i32, i32) {
    %c0_i32 = arith.constant 0 : i32
    %c0_i32_0 = arith.constant 0 : i32
    return %arg1, %c0_i32 : i32, i32
  }
  func.func @transform_8(%arg0: i32, %arg1: i32) -> (i32, i32) {
    %c0_i32 = arith.constant 0 : i32
    %c0_i32_0 = arith.constant 0 : i32
    return %arg1, %c0_i32 : i32, i32
  }
  func.func @transform_9(%arg0: i32, %arg1: i32) -> (i32, i32) {
    %c0_i32 = arith.constant 0 : i32
    %c0_i32_0 = arith.constant 0 : i32
    return %c0_i32, %arg0 : i32, i32
  }
  func.func @transform_10(%arg0: i32, %arg1: i32) -> (i32, i32) {
    %c0_i32 = arith.constant 0 : i32
    %c0_i32_0 = arith.constant 0 : i32
    return %c0_i32, %arg0 : i32, i32
  }
  func.func @transform_11(%arg0: i32, %arg1: i32) -> (i32, i32) {
    %c0_i32 = arith.constant 0 : i32
    %c0_i32_0 = arith.constant 0 : i32
    return %c0_i32, %arg0 : i32, i32
  }
  func.func @transform_12(%arg0: i32, %arg1: i32) -> (i32, i32) {
    %c0_i32 = arith.constant 0 : i32
    %c0_i32_0 = arith.constant 0 : i32
    return %c0_i32, %arg0 : i32, i32
  }
}

</mosaic_0001>

<bundles_post_ra>
// kernel: tpu_custom_call.1
= control target key start
LH: loop header
LB: loop body
LE: loop exit
PB: predicated region body
PF: predicated region fallthrough
CT: control target
= control target key end

     0   :  { %18 = vsyncpa [#allocation5], 0  ;;  %s2440_s0 = inlined_call_operand.vmem [shape: f32[128,32], index: 0, kind: input, shape index: {}]   ;;  %s2441_s1 = inlined_call_operand.vmem [shape: f32[128,32], index: 1, kind: input, shape index: {}]   ;;  %s2442_s2 = inlined_call_operand.vmem [shape: f32[1,128], index: 2, kind: input, shape index: {}]   ;;  %s2443_s3 = inlined_call_operand.vmem [shape: f32[128,1], index: 3, kind: input, shape index: {}]   ;;  %s2444_s4 = inlined_call_operand.vmem [shape: s32[1,128], index: 4, kind: input, shape index: {}]   ;;  %s2445_s5 = inlined_call_operand.vmem [shape: s32[128,1], index: 5, kind: input, shape index: {}]   ;;  %s2446_s6 = inlined_call_operand.vmem [shape: s32[1,128], index: 6, kind: input, shape index: {}]   ;;  %s2447_s7 = inlined_call_operand.vmem [shape: s32[128,1], index: 7, kind: input, shape index: {}]   ;;  %s2448_s8 = inlined_call_operand.vmem [shape: s32[128,1], index: 8, kind: input, shape index: {}]   ;;  %s2449_s9 = inlined_call_operand.hbm [shape: f32[1,128], index: 9, kind: output, shape index: {0}]   ;;  %s2450_s10 = inlined_call_operand.hbm [shape: f32[1,128], index: 10, kind: output, shape index: {1}]   ;;  %s2451_s11 = inlined_call_operand.hbm [shape: f32[1,128], index: 11, kind: output, shape index: {2}]   ;;  %s2452_s12 = inlined_call_operand.hbm [shape: s32[1,128], index: 12, kind: output, shape index: {3}]  }
   0x1   :  { %19 = vsyncpa [#allocation7], 0  ;;  %v60_v0 = vld [vmem:[%s2440_s0 + $0x78] sm:$0xff]  ;;  %vm77_vm0 = vcmask 261120   ;;  %v321_v1 = vld [vmem:[%s2443_s3 + $0x10] sm:$0xff]  ;;  %v2461_v3 = vmov 0  }
   0x2   :  { %v319_v2 = vld [vmem:[%s2443_s3] sm:$0xff]  ;;  %1124 = vset.pattern.permute.xlu1 %v2461_v3  ;;  %1123 = vset.pattern.permute.xlu0 %v2461_v3  ;;  %v59_v4 = vld [vmem:[%s2440_s0 + $0x70] sm:$0xff]  ;;  %v322_v5 = vld [vmem:[%s2443_s3 + $0x18] sm:$0xff] }
   0x3   :  { %1027 = vmatprep.subr.msk.mxu0 %vm77_vm0, %v60_v0  ;;  %1083 = vmatprep.subr.msk.mxu1 %vm77_vm0, %v60_v0  ;;  %v320_v6 = vld [vmem:[%s2443_s3 + $0x8] sm:$0xff]  ;;  %v323_v9 = vld [vmem:[%s2443_s3 + $0x20] sm:$0xff]  ;;  %v326_v11 = vld [vmem:[%s2443_s3 + $0x38] sm:$0xff] }
   0x4   :  { %363 = vperm.xlu1 %1124, %v321_v1   ;;  %353 = vperm.xlu0 %1123, %v319_v2   ;;  %v58_v7 = vld [vmem:[%s2440_s0 + $0x68] sm:$0xff]  ;;  %v57_v10 = vld [vmem:[%s2440_s0 + $0x60] sm:$0xff]  ;;  %v325_v12 = vld [vmem:[%s2443_s3 + $0x30] sm:$0xff] }
   0x5   :  { %1028 = vmatpush3.xpose.msk.msra.mxu0 %vm77_vm0, %v60_v0  ;;  %1099 = vmatpush3.xpose.msk.msra.mxu1 %vm77_vm0, %v60_v0  ;;  %v324_v8 = vld [vmem:[%s2443_s3 + $0x28] sm:$0xff]  ;;  %v56_v13 = vld [vmem:[%s2440_s0 + $0x58] sm:$0xff]  ;;  %v327_v15 = vld [vmem:[%s2443_s3 + $0x40] sm:$0xff] }
   0x6   :  { %1029 = vmatprep.subr.msk.mxu0 %vm77_vm0, %v59_v4  ;;  %1084 = vmatprep.subr.msk.mxu1 %vm77_vm0, %v59_v4  ;;  %v328_v14 = vld [vmem:[%s2443_s3 + $0x48] sm:$0xff]  ;;  %v61_v16 = vld [vmem:[%s2441_s1] sm:$0xff]  ;;  %v55_v18 = vld [vmem:[%s2440_s0 + $0x50] sm:$0xff] }
   0x7   :  { %v69_v17 = vld [vmem:[%s2441_s1 + $0x40] sm:$0xff]  ;;  %1059 = vmatprep.mubr.msk.f32.mxu0 %vm77_vm0, %v61_v16  ;;  %v330_v19 = vld [vmem:[%s2443_s3 + $0x58] sm:$0xff]  ;;  %v329_v20 = vld [vmem:[%s2443_s3 + $0x50] sm:$0xff] }
   0x8   :  { %368 = vperm.xlu1 %1124, %v322_v5   ;;  %358 = vperm.xlu0 %1123, %v320_v6   ;;  %v54_v21 = vld [vmem:[%s2440_s0 + $0x48] sm:$0xff]  ;;  %v331_v23 = vld [vmem:[%s2443_s3 + $0x60] sm:$0xff]  ;;  %v334_v25 = vld [vmem:[%s2443_s3 + $0x78] sm:$0xff] }
   0x9   :  { %1030 = vmatpush3.xpose.msk.msra.mxu0 %vm77_vm0, %v59_v4  ;;  %1100 = vmatpush3.xpose.msk.msra.mxu1 %vm77_vm0, %v59_v4  ;;  %v332_v22 = vld [vmem:[%s2443_s3 + $0x68] sm:$0xff]  ;;  %v53_v24 = vld [vmem:[%s2440_s0 + $0x40] sm:$0xff]  ;;  %v333_v26 = vld [vmem:[%s2443_s3 + $0x70] sm:$0xff] }
   0xa   :  { %1031 = vmatprep.subr.msk.mxu0 %vm77_vm0, %v58_v7  ;;  %1085 = vmatprep.subr.msk.mxu1 %vm77_vm0, %v58_v7  ;;  %v52_v27 = vld [vmem:[%s2440_s0 + $0x38] sm:$0xff]  ;;  %v448_v28 = vld [vmem:[%s2445_s5 + $0x8] sm:$0xff]  ;;  %v447_v29 = vld [vmem:[%s2445_s5] sm:$0xff] }
   0xb   :  { %1071 = vmatprep.mubr.msk.f32.mxu1 %vm77_vm0, %v69_v17  ;;  %v51_v30 = vld [vmem:[%s2440_s0 + $0x30] sm:$0xff] }
   0xc   :  { %378 = vperm.xlu1 %1124, %v324_v8   ;;  %373 = vperm.xlu0 %1123, %v323_v9  }
   0xd   :  { %1032 = vmatpush3.xpose.msk.msra.mxu0 %vm77_vm0, %v58_v7  ;;  %1101 = vmatpush3.xpose.msk.msra.mxu1 %vm77_vm0, %v58_v7 }
   0xe   :  { %1033 = vmatprep.subr.msk.mxu0 %vm77_vm0, %v57_v10  ;;  %1086 = vmatprep.subr.msk.mxu1 %vm77_vm0, %v57_v10 }
  0x10   :  { %388 = vperm.xlu1 %1124, %v326_v11   ;;  %383 = vperm.xlu0 %1123, %v325_v12  }
  0x11   :  { %1034 = vmatpush3.xpose.msk.msra.mxu0 %vm77_vm0, %v57_v10  ;;  %1102 = vmatpush3.xpose.msk.msra.mxu1 %vm77_vm0, %v57_v10 }
  0x12   :  { %1035 = vmatprep.subr.msk.mxu0 %vm77_vm0, %v56_v13  ;;  %1087 = vmatprep.subr.msk.mxu1 %vm77_vm0, %v56_v13 }
  0x14   :  { %398 = vperm.xlu1 %1124, %v328_v14   ;;  %393 = vperm.xlu0 %1123, %v327_v15  }
  0x15   :  { %1036 = vmatpush3.xpose.msk.msra.mxu0 %vm77_vm0, %v56_v13  ;;  %1103 = vmatpush3.xpose.msk.msra.mxu1 %vm77_vm0, %v56_v13 }
  0x16   :  { %1037 = vmatprep.subr.msk.mxu0 %vm77_vm0, %v55_v18  ;;  %1088 = vmatprep.subr.msk.mxu1 %vm77_vm0, %v55_v18 }
  0x18   :  { %408 = vperm.xlu1 %1124, %v330_v19   ;;  %403 = vperm.xlu0 %1123, %v329_v20  }
  0x19   :  { %1038 = vmatpush3.xpose.msk.msra.mxu0 %vm77_vm0, %v55_v18  ;;  %1104 = vmatpush3.xpose.msk.msra.mxu1 %vm77_vm0, %v55_v18 }
  0x1a   :  { %1039 = vmatprep.subr.msk.mxu0 %vm77_vm0, %v54_v21  ;;  %1089 = vmatprep.subr.msk.mxu1 %vm77_vm0, %v54_v21 }
  0x1c   :  { %418 = vperm.xlu1 %1124, %v332_v22   ;;  %413 = vperm.xlu0 %1123, %v331_v23  }
  0x1d   :  { %1040 = vmatpush3.xpose.msk.msra.mxu0 %vm77_vm0, %v54_v21  ;;  %1105 = vmatpush3.xpose.msk.msra.mxu1 %vm77_vm0, %v54_v21 }
  0x1e   :  { %1041 = vmatprep.subr.msk.mxu0 %vm77_vm0, %v53_v24  ;;  %1090 = vmatprep.subr.msk.mxu1 %vm77_vm0, %v53_v24 }
  0x20   :  { %428 = vperm.xlu1 %1124, %v334_v25   ;;  %423 = vperm.xlu0 %1123, %v333_v26  }
  0x21   :  { %1042 = vmatpush3.xpose.msk.msra.mxu0 %vm77_vm0, %v53_v24  ;;  %1106 = vmatpush3.xpose.msk.msra.mxu1 %vm77_vm0, %v53_v24 }
  0x22   :  { %1043 = vmatprep.subr.msk.mxu0 %vm77_vm0, %v52_v27  ;;  %1091 = vmatprep.subr.msk.mxu1 %vm77_vm0, %v52_v27 }
  0x23   :  { %20 = vsyncpa [#allocation10], 0  ;;  %v450_v31 = vld [vmem:[%s2445_s5 + $0x18] sm:$0xff]  ;;  %v449_v32 = vld [vmem:[%s2445_s5 + $0x10] sm:$0xff]  ;;  %s1219_s15 = smov [#allocation6]   ;;  %s1220_s17 = smov [#allocation8]  }
  0x24   :  { %468 = vperm.xlu1 %1124, %v448_v28   ;;  %465 = vperm.xlu0 %1123, %v447_v29   ;;  %v50_v33 = vld [vmem:[%s2440_s0 + $0x28] sm:$0xff]  ;;  %v451_v35 = vld [vmem:[%s2445_s5 + $0x20] sm:$0xff]  ;;  %v454_v37 = vld [vmem:[%s2445_s5 + $0x38] sm:$0xff]  ;;  %s922_s16 = sshll.u32 %s1219_s15, 4  ;;  %s932_s18 = sshll.u32 %s1220_s17, 4  ;;  %s923_s16 = int_to_ptr.vmem [resolvable:$true] %s922_s16  ;;  %s2419_s18 = int_to_ptr.vmem [resolvable:$true] %s932_s18 }
  0x25   :  { %1044 = vmatpush3.xpose.msk.msra.mxu0 %vm77_vm0, %v52_v27  ;;  %1107 = vmatpush3.xpose.msk.msra.mxu1 %vm77_vm0, %v52_v27  ;;  %v452_v34 = vld [vmem:[%s2445_s5 + $0x28] sm:$0xff]  ;;  %v49_v36 = vld [vmem:[%s2440_s0 + $0x20] sm:$0xff]  ;;  %v453_v38 = vld [vmem:[%s2445_s5 + $0x30] sm:$0xff]  ;;  %s1129_s20 = scalar_lea.vmem %s923_s16, 16  ;;  %s1133_s21 = scalar_lea.vmem %s923_s16, 32 }
  0x26   :  { %1045 = vmatprep.subr.msk.mxu0 %vm77_vm0, %v51_v30  ;;  %1092 = vmatprep.subr.msk.mxu1 %vm77_vm0, %v51_v30  ;;  %v48_v39 = vld [vmem:[%s2440_s0 + $0x18] sm:$0xff]  ;;  %v456_v40 = vld [vmem:[%s2445_s5 + $0x48] sm:$0xff]  ;;  %v455_v41 = vld [vmem:[%s2445_s5 + $0x40] sm:$0xff]  ;;  %p1130_p0 = scmp.ne.s32.totalorder %s923_s16, %s1129_s20  ;;  %p1134_p1 = scmp.lt.s32.totalorder %s923_s16, %s923_s16 }
  0x27   :  { %v47_v42 = vld [vmem:[%s2440_s0 + $0x10] sm:$0xff]  ;;  %v458_v43 = vld [vmem:[%s2445_s5 + $0x58] sm:$0xff]  ;;  %v46_v45 = vld [vmem:[%s2440_s0 + $0x8] sm:$0xff]  ;;  %p1135_p2 = scmp.lt.s32.totalorder %s1133_s21, %s1129_s20 }
  0x28   :  { %474 = vperm.xlu1 %1124, %v450_v31   ;;  %471 = vperm.xlu0 %1123, %v449_v32   ;;  %v457_v44 = vld [vmem:[%s2445_s5 + $0x50] sm:$0xff]  ;;  %v460_v46 = vld [vmem:[%s2445_s5 + $0x68] sm:$0xff]  ;;  %v459_v47 = vld [vmem:[%s2445_s5 + $0x60] sm:$0xff] }
  0x29   :  { %1046 = vmatpush3.xpose.msk.msra.mxu0 %vm77_vm0, %v51_v30  ;;  %1108 = vmatpush3.xpose.msk.msra.mxu1 %vm77_vm0, %v51_v30  ;;  %v45_v48 = vld [vmem:[%s2440_s0] sm:$0xff]  ;;  %v462_v49 = vld [vmem:[%s2445_s5 + $0x78] sm:$0xff]  ;;  %v461_v50 = vld [vmem:[%s2445_s5 + $0x70] sm:$0xff]  ;;  %p1136_p3 = por %p1135_p2, %p1134_p1 }
  0x2a   :  { %1047 = vmatprep.subr.msk.mxu0 %vm77_vm0, %v50_v33  ;;  %1093 = vmatprep.subr.msk.mxu1 %vm77_vm0, %v50_v33  ;;  %v62_v51 = vld [vmem:[%s2441_s1 + $0x8] sm:$0xff]  ;;  %v532_v54 = vld [vmem:[%s2447_s7] sm:$0xff]  ;;  %v63_v55 = vld [vmem:[%s2441_s1 + $0x10] sm:$0xff] }
  0x2b   :  { %v70_v52 = vld [vmem:[%s2441_s1 + $0x48] sm:$0xff]  ;;  %v71_v56 = vld [vmem:[%s2441_s1 + $0x50] sm:$0xff]  ;;  %v64_v57 = vld [vmem:[%s2441_s1 + $0x18] sm:$0xff]  ;;  %p1137_p4 = pnand %p1136_p3, %p1130_p0 }
  0x2c   :  { %480 = vperm.xlu1 %1124, %v452_v34   ;;  %477 = vperm.xlu0 %1123, %v451_v35   ;;  %v533_v53 = vld [vmem:[%s2447_s7 + $0x8] sm:$0xff]  ;;  %v72_v58 = vld [vmem:[%s2441_s1 + $0x58] sm:$0xff]  ;;  %v534_v60 = vld [vmem:[%s2447_s7 + $0x10] sm:$0xff] }
  0x2d   :  { %1048 = vmatpush3.xpose.msk.msra.mxu0 %vm77_vm0, %v50_v33  ;;  %1109 = vmatpush3.xpose.msk.msra.mxu1 %vm77_vm0, %v50_v33  ;;  %v535_v59 = vld [vmem:[%s2447_s7 + $0x18] sm:$0xff]  ;;  %v65_v61 = vld [vmem:[%s2441_s1 + $0x20] sm:$0xff]  ;;  %v66_v63 = vld [vmem:[%s2441_s1 + $0x28] sm:$0xff] }
  0x2e   :  { %1049 = vmatprep.subr.msk.mxu0 %vm77_vm0, %v49_v36  ;;  %1094 = vmatprep.subr.msk.mxu1 %vm77_vm0, %v49_v36  ;;  %v73_v62 = vld [vmem:[%s2441_s1 + $0x60] sm:$0xff]  ;;  %v74_v0 = vld [vmem:[%s2441_s1 + $0x68] sm:$0xff]  ;;  %v67_v4 = vld [vmem:[%s2441_s1 + $0x30] sm:$0xff] }
  0x2f   :  { %v537_v1 = vld [vmem:[%s2447_s7 + $0x28] sm:$0xff]  ;;  %v536_v2 = vld [vmem:[%s2447_s7 + $0x20] sm:$0xff]  ;;  %v75_v5 = vld [vmem:[%s2441_s1 + $0x70] sm:$0xff] }
  0x30   :  { %486 = vperm.xlu1 %1124, %v454_v37   ;;  %483 = vperm.xlu0 %1123, %v453_v38   ;;  %v618_v6 = vld [vmem:[%s2448_s8 + $0x8] sm:$0xff]  ;;  %v617_v7 = vld [vmem:[%s2448_s8] sm:$0xff]  ;;  %v68_v8 = vld [vmem:[%s2441_s1 + $0x38] sm:$0xff] }
  0x31   :  { %1050 = vmatpush3.xpose.msk.msra.mxu0 %vm77_vm0, %v49_v36  ;;  %1110 = vmatpush3.xpose.msk.msra.mxu1 %vm77_vm0, %v49_v36  ;;  %v76_v9 = vld [vmem:[%s2441_s1 + $0x78] sm:$0xff]  ;;  %v538_v11 = vld [vmem:[%s2447_s7 + $0x30] sm:$0xff]  ;;  %vm634_vm1 = vcmp.gt.s32.totalorder %v618_v6, 0  ;;  %vm633_vm2 = vcmp.gt.s32.totalorder %v617_v7, 0  ;;  %v622_v16 = vld [vmem:[%s2448_s8 + $0x28] sm:$0xff] }
  0x32   :  { %1051 = vmatprep.subr.msk.mxu0 %vm77_vm0, %v48_v39  ;;  %1095 = vmatprep.subr.msk.mxu1 %vm77_vm0, %v48_v39  ;;  %v539_v10 = vld [vmem:[%s2447_s7 + $0x38] sm:$0xff]  ;;  %v619_v13 = vld [vmem:[%s2448_s8 + $0x10] sm:$0xff]  ;;  %v650_v14 = vsel %vm634_vm1, 1, %v2461_v3  ;;  %v649_v15 = vsel %vm633_vm2, 1, %v2461_v3  ;;  %v621_v17 = vld [vmem:[%s2448_s8 + $0x20] sm:$0xff]  ;;  %vm638_vm5 = vcmp.gt.s32.totalorder %v622_v16, 0 }
  0x33   :  { %v620_v12 = vld [vmem:[%s2448_s8 + $0x18] sm:$0xff]  ;;  %vm635_vm4 = vcmp.gt.s32.totalorder %v619_v13, 0  ;;  %vm637_vm6 = vcmp.gt.s32.totalorder %v621_v17, 0  ;;  %v623_v21 = vld [vmem:[%s2448_s8 + $0x30] sm:$0xff]  ;;  %v654_v22 = vsel %vm638_vm5, 1, %v2461_v3  ;;  %v541_v26 = vld [vmem:[%s2447_s7 + $0x48] sm:$0xff] }
  0x34   :  { %492 = vperm.xlu1 %1124, %v456_v40   ;;  %489 = vperm.xlu0 %1123, %v455_v41   ;;  %vm636_vm3 = vcmp.gt.s32.totalorder %v620_v12, 0  ;;  %v651_v19 = vsel %vm635_vm4, 1, %v2461_v3  ;;  %v624_v20 = vld [vmem:[%s2448_s8 + $0x38] sm:$0xff]  ;;  %v653_v23 = vsel %vm637_vm6, 1, %v2461_v3  ;;  %vm639_vm8 = vcmp.gt.s32.totalorder %v623_v21, 0  ;;  %v540_v27 = vld [vmem:[%s2447_s7 + $0x40] sm:$0xff] }
  0x35   :  { %1052 = vmatpush3.xpose.msk.msra.mxu0 %vm77_vm0, %v48_v39  ;;  %1111 = vmatpush3.xpose.msk.msra.mxu1 %vm77_vm0, %v48_v39  ;;  %v652_v18 = vsel %vm636_vm3, 1, %v2461_v3  ;;  %vm640_vm7 = vcmp.gt.s32.totalorder %v624_v20, 0  ;;  %v655_v25 = vsel %vm639_vm8, 1, %v2461_v3  ;;  %v626_v28 = vld [vmem:[%s2448_s8 + $0x48] sm:$0xff]  ;;  %v625_v29 = vld [vmem:[%s2448_s8 + $0x40] sm:$0xff]  ;;  %v543_v30 = vld [vmem:[%s2447_s7 + $0x58] sm:$0xff] }
  0x36   :  { %1053 = vmatprep.subr.msk.mxu0 %vm77_vm0, %v47_v42  ;;  %1096 = vmatprep.subr.msk.mxu1 %vm77_vm0, %v47_v42  ;;  %v656_v24 = vsel %vm640_vm7, 1, %v2461_v3  ;;  %v542_v31 = vld [vmem:[%s2447_s7 + $0x50] sm:$0xff]  ;;  %vm642_vm9 = vcmp.gt.s32.totalorder %v626_v28, 0  ;;  %vm641_vm10 = vcmp.gt.s32.totalorder %v625_v29, 0  ;;  %v628_v32 = vld [vmem:[%s2448_s8 + $0x58] sm:$0xff]  ;;  %v545_v38 = vld [vmem:[%s2447_s7 + $0x68] sm:$0xff] }
  0x37   :  { %v627_v33 = vld [vmem:[%s2448_s8 + $0x50] sm:$0xff]  ;;  %v658_v34 = vsel %vm642_vm9, 1, %v2461_v3  ;;  %v657_v35 = vsel %vm641_vm10, 1, %v2461_v3  ;;  %vm644_vm11 = vcmp.gt.s32.totalorder %v628_v32, 0  ;;  %v544_v39 = vld [vmem:[%s2447_s7 + $0x60] sm:$0xff]  ;;  %v630_v40 = vld [vmem:[%s2448_s8 + $0x68] sm:$0xff] }
  0x38   :  { %498 = vperm.xlu1 %1124, %v458_v43   ;;  %495 = vperm.xlu0 %1123, %v457_v44   ;;  %vm643_vm12 = vcmp.gt.s32.totalorder %v627_v33, 0  ;;  %v660_v36 = vsel %vm644_vm11, 1, %v2461_v3  ;;  %v629_v41 = vld [vmem:[%s2448_s8 + $0x60] sm:$0xff]  ;;  %v546_v43 = vld [vmem:[%s2447_s7 + $0x70] sm:$0xff]  ;;  %vm646_vm13 = vcmp.gt.s32.totalorder %v630_v40, 0  ;;  %v632_v44 = vld [vmem:[%s2448_s8 + $0x78] sm:$0xff] }
  0x39   :  { %1054 = vmatpush3.xpose.msk.msra.mxu0 %vm77_vm0, %v47_v42  ;;  %1112 = vmatpush3.xpose.msk.msra.mxu1 %vm77_vm0, %v47_v42  ;;  %v659_v37 = vsel %vm643_vm12, 1, %v2461_v3  ;;  %v547_v42 = vld [vmem:[%s2447_s7 + $0x78] sm:$0xff]  ;;  %vm645_vm14 = vcmp.gt.s32.totalorder %v629_v41, 0  ;;  %vm648_vm15 = vcmp.gt.s32.totalorder %v632_v44, 0  ;;  %vm2462_vm5 = vmmov 1  }
  0x3a   :  { %1055 = vmatprep.subr.msk.mxu0 %vm77_vm0, %v46_v45  ;;  %1097 = vmatprep.subr.msk.mxu1 %vm77_vm0, %v46_v45 }
  0x3c   :  { %504 = vperm.xlu1 %1124, %v460_v46   ;;  %501 = vperm.xlu0 %1123, %v459_v47   ;;  %v662_v46 = vsel %vm646_vm13, 1, %v2461_v3  ;;  %v661_v47 = vsel %vm645_vm14, 1, %v2461_v3 }
  0x3d   :  { %1056 = vmatpush3.xpose.msk.msra.mxu0 %vm77_vm0, %v46_v45  ;;  %1113 = vmatpush3.xpose.msk.msra.mxu1 %vm77_vm0, %v46_v45  ;;  %v631_v45 = vld [vmem:[%s2448_s8 + $0x70] sm:$0xff] }
  0x3e   :  { %1057 = vmatprep.subr.msk.mxu0 %vm77_vm0, %v45_v48  ;;  %1098 = vmatprep.subr.msk.mxu1 %vm77_vm0, %v45_v48 }
  0x40   :  { %510 = vperm.xlu1 %1124, %v462_v49   ;;  %507 = vperm.xlu0 %1123, %v461_v50  }
  0x41   :  { %1058 = vmatpush3.xpose.msk.msra.mxu0 %vm77_vm0, %v45_v48  ;;  %1114 = vmatpush3.xpose.msk.msra.mxu1 %vm77_vm0, %v45_v48  ;;  %v664_v48 = vsel %vm648_vm15, 1, %v2461_v3 }
  0x44   :  { %1060 = vmatmul.mubr.msk.f32.vlgmr.msra.gmra.mxu0 %vm77_vm0, %v62_v51  ;;  %1072 = vmatmul.mubr.msk.f32.vlgmr.msra.gmra.mxu1 %vm77_vm0, %v70_v52 }
  0x45   :  { %553 = vperm.xlu1 %1124, %v533_v53   ;;  %550 = vperm.xlu0 %1123, %v532_v54  }
  0x46   :  { %1062 = vmatprep.mubr.msk.f32.mxu0 %vm77_vm0, %v63_v55  ;;  %1074 = vmatprep.mubr.msk.f32.mxu1 %vm77_vm0, %v71_v56 }
  0x48   :  { %1063 = vmatmul.mubr.msk.f32.gmra.mxu0 %vm77_vm0, %v64_v57  ;;  %1075 = vmatmul.mubr.msk.f32.gmra.mxu1 %vm77_vm0, %v72_v58 }
  0x49   :  { %559 = vperm.xlu1 %1124, %v535_v59   ;;  %556 = vperm.xlu0 %1123, %v534_v60  }
  0x4a   :  { %1065 = vmatprep.mubr.msk.f32.mxu0 %vm77_vm0, %v65_v61  ;;  %1077 = vmatprep.mubr.msk.f32.mxu1 %vm77_vm0, %v73_v62 }
  0x4c   :  { %1066 = vmatmul.mubr.msk.f32.gmra.mxu0 %vm77_vm0, %v66_v63  ;;  %1078 = vmatmul.mubr.msk.f32.gmra.mxu1 %vm77_vm0, %v74_v0 }
  0x4d   :  { %565 = vperm.xlu1 %1124, %v537_v1   ;;  %562 = vperm.xlu0 %1123, %v536_v2   ;;  %v1216_v2 = vmov -1e+30  }
  0x4e   :  { %1068 = vmatprep.mubr.msk.f32.mxu0 %vm77_vm0, %v67_v4  ;;  %1080 = vmatprep.mubr.msk.f32.mxu1 %vm77_vm0, %v75_v5  ;;  %43 = vst [vmem:[#allocation2] sm:$0x1] %v1216_v2  ;;  %v1217_v4 = vmov 1e+30  }
  0x4f   :  { %44 = vst [vmem:[#allocation3] sm:$0x1] %v1217_v4  ;;  %v2501_v4 = vmov 0 }
  0x50   :  { %1069 = vmatmul.mubr.msk.f32.gmra.mxu0 %vm77_vm0, %v68_v8  ;;  %1081 = vmatmul.mubr.msk.f32.gmra.mxu1 %vm77_vm0, %v76_v9  ;;  %vm647_vm0 = vcmp.gt.s32.totalorder %v631_v45, 0  ;;  %v1763_v45 = vld [vmem:[%s2444_s4] ss:$0 sm:$0xff] }
  0x51   :  { %571 = vperm.xlu1 %1124, %v539_v10   ;;  %568 = vperm.xlu0 %1123, %v538_v11   ;;  %v663_v49 = vsel %vm647_vm0, 1, %v2461_v3  ;;  %v2522_v3 = vmov 0 }
  0x55   :  { %669 = vperm.xlu1 %1124, %v650_v14   ;;  %666 = vperm.xlu0 %1123, %v649_v15  }
  0x59   :  { %675 = vperm.xlu1 %1124, %v652_v18   ;;  %672 = vperm.xlu0 %1123, %v651_v19  }
  0x5d   :  { %681 = vperm.xlu1 %1124, %v654_v22   ;;  %678 = vperm.xlu0 %1123, %v653_v23  }
  0x61   :  { %687 = vperm.xlu1 %1124, %v656_v24   ;;  %684 = vperm.xlu0 %1123, %v655_v25  }
  0x65   :  { %577 = vperm.xlu1 %1124, %v541_v26   ;;  %574 = vperm.xlu0 %1123, %v540_v27  }
  0x69   :  { %583 = vperm.xlu1 %1124, %v543_v30   ;;  %580 = vperm.xlu0 %1123, %v542_v31  }
  0x6d   :  { %693 = vperm.xlu1 %1124, %v658_v34   ;;  %690 = vperm.xlu0 %1123, %v657_v35  }
  0x71   :  { %699 = vperm.xlu1 %1124, %v660_v36   ;;  %696 = vperm.xlu0 %1123, %v659_v37  }
  0x75   :  { %589 = vperm.xlu1 %1124, %v545_v38   ;;  %586 = vperm.xlu0 %1123, %v544_v39  }
  0x79   :  { %595 = vperm.xlu1 %1124, %v547_v42   ;;  %592 = vperm.xlu0 %1123, %v546_v43  }
  0x7d   :  { %705 = vperm.xlu1 %1124, %v662_v46   ;;  %702 = vperm.xlu0 %1123, %v661_v47   ;;  %v1774_v47 = vld [vmem:[%s2446_s6] ss:$0 sm:$0xff] }
  0x7f   :  { %v1674_v50 = vpop.permute.xlu1 %363  ;;  %v1676_v51 = vpop.permute.xlu0 %353 }
  0x81   :  { %711 = vperm.xlu1 %1124, %v664_v48   ;;  %708 = vperm.xlu0 %1123, %v663_v49   ;;  %v2499_v49 = vmov 0 }
  0x83   :  { %v1678_v52 = vpop.permute.xlu1 %368  ;;  %v1680_v53 = vpop.permute.xlu0 %358 }
  0x87   :  { %v1682_v54 = vpop.permute.xlu1 %378  ;;  %v1684_v55 = vpop.permute.xlu0 %373 }
  0x88   :  { %2490 = vst [vmem:[#allocation14_spill] sm:$0xff] %v1684_v55  ;;  %v2553_v55 = vmov 0 }
  0x8b   :  { %v1686_v56 = vpop.permute.xlu1 %388  ;;  %v1688_v57 = vpop.permute.xlu0 %383 }
  0x8c   :  { %2491 = vst [vmem:[#allocation15_spill] sm:$0xff] %v1686_v56  ;;  %2492 = vst [vmem:[#allocation16_spill] sm:$0xff] %v1688_v57  ;;  %v2531_v57 = vmov 0 }
  0x8f   :  { %v1690_v58 = vpop.permute.xlu1 %398  ;;  %v1692_v59 = vpop.permute.xlu0 %393 }
  0x93   :  { %v1694_v60 = vpop.permute.xlu1 %408  ;;  %v1696_v61 = vpop.permute.xlu0 %403 }
  0x97   :  { %v1698_v62 = vpop.permute.xlu1 %418  ;;  %v1700_v63 = vpop.permute.xlu0 %413 }
  0x98   :  { %2493 = vst [vmem:[#allocation17_spill] sm:$0xff] %v1698_v62  ;;  %2494 = vst [vmem:[#allocation18_spill] sm:$0xff] %v1700_v63 }
  0x9b   :  { %v1702_v0 = vpop.permute.xlu1 %428  ;;  %v1704_v1 = vpop.permute.xlu0 %423 }
  0x9c   :  { %2495 = vst [vmem:[#allocation19_spill] sm:$0xff] %v1702_v0  ;;  %2496 = vst [vmem:[#allocation20_spill] sm:$0xff] %v1704_v1 }
  0x9f   :  { %v1706_v5 = vpop.permute.xlu1 %468  ;;  %v1708_v6 = vpop.permute.xlu0 %465 }
  0xa0   :  { %vm2454_vm1 = vcmp.eq.s32.totalorder %v1706_v5, %v1763_v45  ;;  %vm2453_vm2 = vcmp.eq.s32.totalorder %v1708_v6, %v1763_v45 }
  0xa1   :  { %vm1784_vm6 = vmxor %vm2454_vm1, %vm2462_vm5 }
  0xa2   :  { %v2500_v49 = vsel %vm1784_vm6, 4294967295, %v2499_v49  ;;  %vm1794_vm8 = vmxor %vm2453_vm2, %vm2462_vm5 }
  0xa3   :  { %v1710_v7 = vpop.permute.xlu1 %474  ;;  %v1712_v8 = vpop.permute.xlu0 %471  ;;  %v2502_v4 = vsel %vm1794_vm8, 4294967295, %v2501_v4 }
  0xa4   :  { %vm2455_vm3 = vcmp.eq.s32.totalorder %v1710_v7, %v1763_v45 }
  0xa5   :  { %vm1807_vm13 = vmxor %vm2455_vm3, %vm2462_vm5 }
  0xa7   :  { %v1714_v9 = vpop.permute.xlu1 %480  ;;  %v1716_v10 = vpop.permute.xlu0 %477 }
  0xa8   :  { %vm2457_vm9 = vcmp.eq.s32.totalorder %v1714_v9, %v1763_v45 }
  0xab   :  { %v1718_v11 = vpop.permute.xlu1 %486  ;;  %v1720_v12 = vpop.permute.xlu0 %483 }
  0xaf   :  { %v1722_v13 = vpop.permute.xlu1 %492  ;;  %v1724_v14 = vpop.permute.xlu0 %489 }
  0xb3   :  { %v1726_v15 = vpop.permute.xlu1 %498  ;;  %v1728_v16 = vpop.permute.xlu0 %495 }
  0xb4   :  { %2497 = vst [vmem:[#allocation21_spill] sm:$0xff] %v1728_v16 }
  0xb7   :  { %v1730_v17 = vpop.permute.xlu1 %504  ;;  %v1732_v18 = vpop.permute.xlu0 %501 }
  0xbb   :  { %v1734_v19 = vpop.permute.xlu1 %510  ;;  %v1736_v20 = vpop.permute.xlu0 %507 }
  0xbc   :  { %2498 = vst [vmem:[#allocation22_spill] sm:$0xff] %v1736_v20 }
  0xc0   :  { %v554_v21 = vpop.permute.xlu1 %553  ;;  %v551_v22 = vpop.permute.xlu0 %550 }
  0xc1   :  { %vm602_vm11 = vcmp.ne.s32.totalorder %v554_v21, %v1774_v47  ;;  %vm601_vm15 = vcmp.ne.s32.totalorder %v551_v22, %v1774_v47  ;;  %v2507_v21 = vmov 0  ;;  %v2512_v22 = vmov 0 }
  0xc4   :  { %v560_v23 = vpop.permute.xlu1 %559  ;;  %v557_v24 = vpop.permute.xlu0 %556 }
  0xc5   :  { %vm604_vm1 = vcmp.ne.s32.totalorder %v560_v23, %v1774_v47  ;;  %v2514_v23 = vmov 0 }
  0xc8   :  { %v566_v25 = vpop.permute.xlu1 %565  ;;  %v1738_v26 = vpop.permute.xlu0 %562 }
  0xcc   :  { %v1740_v27 = vpop.permute.xlu1 %571  ;;  %v1742_v28 = vpop.permute.xlu0 %568 }
  0xd0   :  { %v670_v29 = vpop.permute.xlu1 %669  ;;  %v667_v30 = vpop.permute.xlu0 %666 }
  0xd1   :  { %vm714_vm4 = vcmp.eq.s32.totalorder %v670_v29, 1  ;;  %vm713_vm7 = vcmp.eq.s32.totalorder %v667_v30, 1  ;;  %v2503_v29 = vmov 0  ;;  %v2505_v30 = vmov 0 }
  0xd2   :  { %v2504_v29 = vsel %vm1807_vm13, 4294967295, %v2503_v29  ;;  %vm1814_vm0 = vmand %vm602_vm11, %vm714_vm4  ;;  %vm2511_vm4 = vcmp.eq.s32.totalorder %v1722_v13, %v1763_v45 }
  0xd3   :  { %v2506_v30 = vsel %vm1814_vm0, 4294967295, %v2505_v30  ;;  %vm1819_vm10 = vmand %vm601_vm15, %vm713_vm7  ;;  %vm603_vm15 = vcmp.ne.s32.totalorder %v557_v24, %v1774_v47  ;;  %v2520_v24 = vmov 0 }
  0xd4   :  { %v676_v31 = vpop.permute.xlu1 %675  ;;  %v673_v32 = vpop.permute.xlu0 %672  ;;  %v2508_v21 = vsel %vm1819_vm10, 4294967295, %v2507_v21  ;;  %vm1827_vm13 = vmxor %vm2457_vm9, %vm2462_vm5  ;;  %vm605_vm9 = vcmp.ne.s32.totalorder %v1738_v26, %v1774_v47 }
  0xd5   :  { %vm716_vm12 = vcmp.eq.s32.totalorder %v676_v31, 1  ;;  %vm715_vm2 = vcmp.eq.s32.totalorder %v673_v32, 1  ;;  %v2509_v31 = vmov 0  ;;  %vm1835_vm11 = vmxor %vm2511_vm4, %vm2462_vm5 }
  0xd6   :  { %v2510_v31 = vsel %vm1827_vm13, 4294967295, %v2509_v31  ;;  %v2513_v22 = vsel %vm1835_vm11, 4294967295, %v2512_v22  ;;  %vm1842_vm14 = vmand %vm604_vm1, %vm716_vm12  ;;  %vm2517_vm13 = vcmp.eq.s32.totalorder %v1712_v8, %v1763_v45  ;;  %vm606_vm11 = vcmp.ne.s32.totalorder %v566_v25, %v1774_v47 }
  0xd7   :  { %v2515_v23 = vsel %vm1842_vm14, 4294967295, %v2514_v23  ;;  %vm1852_vm4 = vmxor %vm2517_vm13, %vm2462_vm5  ;;  %v2525_v25 = vmov 0 }
  0xd8   :  { %v682_v33 = vpop.permute.xlu1 %681  ;;  %v679_v34 = vpop.permute.xlu0 %678  ;;  %vm1859_vm1 = vmand %vm603_vm15, %vm715_vm2  ;;  %vm2524_vm2 = vcmp.eq.s32.totalorder %v1724_v14, %v1763_v45 }
  0xd9   :  { %vm718_vm3 = vcmp.eq.s32.totalorder %v682_v33, 1  ;;  %v2518_v33 = vmov 0  ;;  %v2521_v24 = vsel %vm1859_vm1, 4294967295, %v2520_v24  ;;  %vm1878_vm15 = vmxor %vm2524_vm2, %vm2462_vm5  ;;  %vm2530_vm13 = vcmp.eq.s32.totalorder %v679_v34, 1 }
  0xda   :  { %v2519_v33 = vsel %vm1852_vm4, 4294967295, %v2518_v33  ;;  %vm1865_vm14 = vmand %vm606_vm11, %vm718_vm3  ;;  %v2526_v25 = vsel %vm1878_vm15, 4294967295, %v2525_v25  ;;  %vm2527_vm3 = vcmp.eq.s32.totalorder %v1706_v5, %v1763_v45  ;;  %vm2533_vm15 = vmmov 1  }
  0xdb   :  { %v2523_v3 = vsel %vm1865_vm14, 4294967295, %v2522_v3  ;;  %vm1887_vm11 = vmand %vm2527_vm3, %vm1814_vm0  ;;  %vm2534_vm3 = vcmp.eq.s32.totalorder %v1716_v10, %v1763_v45  ;;  %v2535_v5 = vmov 0  ;;  %vm607_vm2 = vcmp.ne.s32.totalorder %v1742_v28, %v1774_v47 }
  0xdc   :  { %v1744_v35 = vpop.permute.xlu1 %687  ;;  %v1746_v36 = vpop.permute.xlu0 %684  ;;  %vm1896_vm12 = vmand %vm605_vm9, %vm2530_vm13  ;;  %vm608_vm9 = vcmp.ne.s32.totalorder %v1740_v27, %v1774_v47  ;;  %v2544_v27 = vmov 0  ;;  %v2550_v28 = vmov 0 }
  0xdd   :  { %v2532_v57 = vsel %vm1896_vm12, 4294967295, %v2531_v57  ;;  %vm1906_vm4 = vmxor %vm2534_vm3, %vm2533_vm15  ;;  %vm2540_vm3 = vcmp.eq.s32.totalorder %v1708_v6, %v1763_v45  ;;  %vm2543_vm7 = vcmp.eq.s32.totalorder %v1744_v35, 1  ;;  %v2547_v6 = vmov 0 }
  0xde   :  { %v2536_v5 = vsel %vm1906_vm4, 4294967295, %v2535_v5  ;;  %vm1926_vm4 = vmand %vm2540_vm3, %vm1819_vm10 }
  0xdf   :  { %vm1932_vm0 = vmand %vm608_vm9, %vm2543_vm7  ;;  %vm2549_vm9 = vcmp.eq.s32.totalorder %v1746_v36, 1  ;;  %v2604_v36 = vmov 0 }
  0xe0   :  { %v578_v37 = vpop.permute.xlu1 %577  ;;  %v1748_v38 = vpop.permute.xlu0 %574  ;;  %v2545_v27 = vsel %vm1932_vm0, 4294967295, %v2544_v27  ;;  %vm2582_vm0 = vcmp.eq.s32.totalorder %v1724_v14, %v1763_v45  ;;  %v2586_v14 = vmov 0 }
  0xe1   :  { %vm610_vm5 = vcmp.ne.s32.totalorder %v578_v37, %v1774_v47  ;;  %v2541_v37 = vmov 0  ;;  %vm609_vm7 = vcmp.ne.s32.totalorder %v1748_v38, %v1774_v47 }
  0xe2   :  { %v2542_v37 = vsel %vm1926_vm4, 4294967295, %v2541_v37  ;;  %vm2591_vm4 = vnez %v2506_v30 }
  0xe4   :  { %v1750_v39 = vpop.permute.xlu1 %583  ;;  %v1752_v40 = vpop.permute.xlu0 %580 }
  0xe8   :  { %v694_v41 = vpop.permute.xlu1 %693  ;;  %v1754_v42 = vpop.permute.xlu0 %690 }
  0xe9   :  { %vm2537_vm13 = vcmp.eq.s32.totalorder %v694_v41, 1 }
  0xea   :  { %vm1915_vm12 = vmand %vm610_vm5, %vm2537_vm13  ;;  %vm2546_vm13 = vcmp.eq.s32.totalorder %v1718_v11, %v1763_v45 }
  0xeb   :  { %vm1941_vm6 = vmxor %vm2546_vm13, %vm2533_vm15  ;;  %vm2552_vm13 = vcmp.eq.s32.totalorder %v1726_v15, %v1763_v45 }
  0xec   :  { %v1756_v43 = vpop.permute.xlu1 %699  ;;  %v1758_v44 = vpop.permute.xlu0 %696  ;;  %v2548_v6 = vsel %vm1941_vm6, 4294967295, %v2547_v6  ;;  %vm1953_vm5 = vmand %vm607_vm2, %vm2549_vm9  ;;  %vm2555_vm9 = vnez %v2515_v23  ;;  %vm2560_vm2 = vcmp.eq.s32.totalorder %v1722_v13, %v1763_v45  ;;  %v2564_v13 = vmov 0 }
  0xed   :  { %v2551_v28 = vsel %vm1953_vm5, 4294967295, %v2550_v28  ;;  %vm1963_vm3 = vmxor %vm2552_vm13, %vm2533_vm15  ;;  %vm2556_vm5 = vcmp.eq.s32.totalorder %v1710_v7, %v1763_v45  ;;  %vm2574_vm6 = vnez %v2513_v22 }
  0xee   :  { %v2554_v55 = vsel %vm1963_vm3, 4294967295, %v2553_v55  ;;  %vm1976_vm10 = vmand %vm2556_vm5, %vm2555_vm9  ;;  %vm2563_vm9 = vcmp.eq.s32.totalorder %v1712_v8, %v1763_v45  ;;  %v2571_v8 = vmov 0  ;;  %vm612_vm3 = vcmp.ne.s32.totalorder %v1750_v39, %v1774_v47 }
  0xef   :  { %vm1991_vm8 = vmand %vm2560_vm2, %vm1915_vm12  ;;  %vm2566_vm2 = vcmp.eq.s32.totalorder %v1754_v42, 1  ;;  %v2576_v39 = vmov 0 }
  0xf0   :  { %v1765_v46 = vpop.permute.xlu1 %589  ;;  %v1776_v48 = vpop.permute.xlu0 %586  ;;  %vm2005_vm13 = vmand %vm2563_vm9, %vm1859_vm1  ;;  %vm2570_vm9 = vcmp.eq.s32.totalorder %v1714_v9, %v1763_v45 }
  0xf1   :  { %v2565_v13 = vsel %vm2005_vm13, 4294967295, %v2564_v13  ;;  %vm2011_vm5 = vmand %vm609_vm7, %vm2566_vm2  ;;  %vm2575_vm2 = vcmp.eq.s32.totalorder %v1730_v17, %v1763_v45 }
  0xf2   :  { %vm2075_vm1 = vmand %vm2582_vm0, %vm2011_vm5 }
  0xf4   :  { %v1788_v2 = vpop.permute.xlu1 %595  ;;  %v1846_v32 = vpop.permute.xlu0 %592 }
  0xf5   :  { %2516 = vst [vmem:[#allocation23_spill] sm:$0xff] %v1846_v32 }
  0xf8   :  { %v1870_v1 = vpop.permute.xlu1 %705  ;;  %v1957_v35 = vpop.permute.xlu0 %702 }
  0xfc   :  { %v2015_v20 = vpop.permute.xlu1 %711 }
  0xfd   :  { %2569 = vst [vmem:[#allocation24_spill] sm:$0xff] %v2015_v20  ;;  %v2097_v20 = vpop.permute.xlu0 %708 }
 0x104   :  { %v1061_v41 = vpop.f32.mrf.mxu0  ;;  %v1073_v0 = vpop.f32.mrf.mxu1 }
 0x105   :  { %v336_v63 = vmul.f32 2.0, %v1061_v41  ;;  %v344_v56 = vmul.f32 2.0, %v1073_v0  ;;  %v2557_v0 = vmov 0 }
 0x106   :  { %v2558_v0 = vsel %vm1976_vm10, 4294967295, %v2557_v0  ;;  %v240_v7 = vpop.f32.mrf.mxu0  ;;  %v280_v41 = vpop.f32.mrf.mxu1  ;;  %vm2025_vm10 = vmand %vm2570_vm9, %vm1865_vm14  ;;  %vm2579_vm9 = vcmp.eq.s32.totalorder %v1756_v43, 1 }
 0x107   :  { %v2018_v32 = vsub.f32 %v1680_v53, %v336_v63  ;;  %v335_v62 = vmul.f32 2.0, %v240_v7  ;;  %v343_v16 = vmul.f32 2.0, %v280_v41  ;;  %v2572_v8 = vsel %vm2025_vm10, 4294967295, %v2571_v8  ;;  %vm2049_vm14 = vmxor %vm2575_vm2, %vm2533_vm15 }
 0x108   :  { %v2043_v53 = vsub.f32 %v1690_v58, %v344_v56  ;;  %v1064_v63 = vpop.f32.mrf.mxu0  ;;  %v1076_v9 = vpop.f32.mrf.mxu1  ;;  %v2577_v39 = vsel %vm2049_vm14, 4294967295, %v2576_v39  ;;  %vm2059_vm7 = vmand %vm612_vm3, %vm2579_vm9  ;;  %vm2585_vm2 = vcmp.eq.s32.totalorder %v1720_v12, %v1763_v45  ;;  %vm2589_vm3 = vnez %v2526_v25 }
 0x109   :  { %v2068_v58 = vsub.f32 %v1676_v51, %v335_v62  ;;  %v2083_v43 = vsub.f32 %v1692_v59, %v343_v16  ;;  %v338_v7 = vmul.f32 2.0, %v1064_v63  ;;  %v346_v51 = vmul.f32 2.0, %v1076_v9  ;;  %vm2089_vm0 = vmxor %vm2585_vm2, %vm2533_vm15 }
 0x10a   :  { %v250_v62 = vpop.f32.mrf.mxu0  ;;  %v290_v41 = vpop.f32.mrf.mxu1  ;;  %v2587_v14 = vsel %vm2089_vm0, 4294967295, %v2586_v14  ;;  %v794_v59 = vsel %vm1887_vm11, %v2018_v32, -1e+30  ;;  %vm2590_vm10 = vnez %v2500_v49  ;;  %vm2593_vm0 = vnez %v2532_v57 }
 0x10b   :  { %2588 = vst [vmem:[#allocation25_spill] sm:$0xff] %v2587_v14  ;;  %vm2592_vm2 = vmand %vm2590_vm10, %vm2591_vm4  ;;  %v337_v63 = vmul.f32 2.0, %v250_v62  ;;  %v345_v9 = vmul.f32 2.0, %v290_v41  ;;  %vm2594_vm9 = vcmp.eq.s32.totalorder %v1716_v10, %v1763_v45  ;;  %v2595_v14 = vmov 0  ;;  %v2678_v41 = vld [vmem:[#allocation19_spill] sm:$0xff] }
 0x10c   :  { %v2108_v16 = vsel %vm2592_vm2, %v2018_v32, 1e+30  ;;  %vm2115_vm13 = vmand %vm2594_vm9, %vm2593_vm0  ;;  %vm2598_vm10 = vcmp.eq.s32.totalorder %v1726_v15, %v1763_v45  ;;  %v802_v10 = vsel %vm1991_vm8, %v2043_v53, -1e+30  ;;  %v2144_v15 = vsub.f32 %v1678_v52, %v338_v7  ;;  %v1067_v26 = vpop.f32.mrf.mxu0  ;;  %v1079_v62 = vpop.f32.mrf.mxu1 }
 0x10d   :  { %v2596_v14 = vsel %vm2115_vm13, 4294967295, %v2595_v14  ;;  %vm2128_vm4 = vmand %vm2598_vm10, %vm2059_vm7  ;;  %v2147_v32 = vsub.f32 %v1694_v60, %v346_v51  ;;  %vm2602_vm10 = vcmp.eq.s32.totalorder %v1758_v44, 1  ;;  %vm2603_vm8 = vcmp.ne.s32.totalorder %v1752_v40, %v1774_v47  ;;  %v2641_v51 = vld [vmem:[#allocation23_spill] sm:$0xff] }
 0x10e   :  { %vm2601_vm2 = vmand %vm2574_vm6, %vm1915_vm12  ;;  %vm2606_vm6 = vnez %v2542_v37  ;;  %v2162_v52 = vsub.f32 %v1674_v50, %v337_v63  ;;  %v340_v60 = vmul.f32 2.0, %v1067_v26  ;;  %v348_v34 = vmul.f32 2.0, %v1079_v62 }
 0x10f   :  { %v839_v30 = vsel %vm2601_vm2, %v2043_v53, 1e+30  ;;  %vm2154_vm14 = vmand %vm2603_vm8, %vm2602_vm10  ;;  %v793_v22 = vsel %vm2606_vm6, %v2068_v58, -1e+30  ;;  %vm2607_vm12 = vcmp.eq.s32.totalorder %v1732_v18, %v1763_v45  ;;  %v2608_v44 = vmov 0  ;;  %v300_v53 = vpop.f32.mrf.mxu1 }
 0x110   :  { %v2605_v36 = vsel %vm2154_vm14, 4294967295, %v2604_v36  ;;  %vm2168_vm2 = vmxor %vm2607_vm12, %vm2533_vm15  ;;  %vm2610_vm10 = vnez %v2545_v27  ;;  %vm2611_vm8 = vcmp.eq.s32.totalorder %v1718_v11, %v1763_v45  ;;  %v2612_v40 = vmov 0 }
 0x111   :  { %v2609_v44 = vsel %vm2168_vm2, 4294967295, %v2608_v44  ;;  %vm2177_vm9 = vmand %vm2611_vm8, %vm2610_vm10  ;;  %vm2614_vm6 = vnez %v2548_v6  ;;  %vm2615_vm11 = vcmp.eq.s32.totalorder %v1870_v1, 1  ;;  %vm2616_vm12 = vcmp.ne.s32.totalorder %v1765_v46, %v1774_v47  ;;  %v1082_v7 = vpop.f32.mrf.mxu1 }
 0x112   :  { %v2613_v40 = vsel %vm2177_vm9, 4294967295, %v2612_v40  ;;  %vm2190_vm2 = vmand %vm2616_vm12, %vm2615_vm11  ;;  %vm2619_vm8 = vnez %v2502_v4  ;;  %vm2620_vm13 = vnez %v2508_v21  ;;  %v801_v37 = vsel %vm2075_vm1, %v2083_v43, -1e+30  ;;  %v260_v4 = vpop.f32.mrf.mxu0  ;;  %v2660_v50 = vld [vmem:[#allocation25_spill] sm:$0xff] }
 0x113   :  { %vm2621_vm9 = vmand %vm2619_vm8, %vm2620_vm13  ;;  %v2212_v46 = vsub.f32 %v1696_v61, %v345_v9  ;;  %vm2623_vm13 = vnez %v2554_v55  ;;  %vm2624_vm1 = vnez %v2558_v0  ;;  %v804_v25 = vsel %vm2128_vm4, %v2147_v32, -1e+30  ;;  %v310_v62 = vpop.f32.mrf.mxu1 }
 0x114   :  { %v2200_v11 = vsel %vm2621_vm9, %v2068_v58, 1e+30  ;;  %vm2622_vm11 = vmand %vm2589_vm3, %vm2011_vm5  ;;  %v796_v21 = vsel %vm2624_vm1, %v2144_v15, -1e+30  ;;  %vm2625_vm5 = vnez %v2504_v29  ;;  %vm2626_vm3 = vnez %v2515_v23  ;;  %v870_v23 = vld [vmem:[#allocation3] sm:$0x1] }
 0x115   :  { %v838_v1 = vsel %vm2622_vm11, %v2083_v43, 1e+30  ;;  %vm788_vm9 = vmand %vm2623_vm13, %vm2059_vm7  ;;  %v436_v55 = vsub.f32 %v1682_v54, %v340_v60  ;;  %vm2628_vm7 = vcmp.eq.s32.totalorder %v1734_v19, %v1763_v45  ;;  %vm2631_vm13 = vnez %v2551_v28  ;;  %v2635_v54 = vld [vmem:[#allocation21_spill] sm:$0xff]  ;;  %v1070_v43 = vpop.f32.mrf.mxu0 }
 0x116   :  { %vm2627_vm8 = vmand %vm2625_vm5, %vm2626_vm3  ;;  %vm2632_vm1 = vcmp.eq.s32.totalorder %v1720_v12, %v1763_v45  ;;  %v2633_v29 = vmov 0  ;;  %vm2636_vm3 = vcmp.eq.s32.totalorder %v2635_v54, %v1763_v45  ;;  %v841_v38 = vsel %vm788_vm9, %v2147_v32, 1e+30  ;;  %v2640_v12 = vld [vmem:[#allocation17_spill] sm:$0xff] }
 0x117   :  { %v2228_v61 = vsel %vm2627_vm8, %v2144_v15, 1e+30  ;;  %vm2238_vm11 = vmxor %vm2628_vm7, %vm2533_vm15  ;;  %vm2639_vm7 = vnez %v2565_v13  ;;  %v444_v58 = vsub.f32 %v2640_v12, %v348_v34  ;;  %v339_v42 = vmul.f32 2.0, %v260_v4  ;;  %v270_v26 = vpop.f32.mrf.mxu0 }
 0x118   :  { %vm2247_vm5 = vmand %vm2632_vm1, %vm2631_vm13  ;;  %v795_v56 = vsel %vm2639_vm7, %v2162_v52, -1e+30  ;;  %vm2645_vm9 = vnez %v2572_v8  ;;  %vm2646_vm7 = vnez %v2510_v31  ;;  %vm2647_vm0 = vnez %v2523_v3 }
 0x119   :  { %v2634_v29 = vsel %vm2247_vm5, 4294967295, %v2633_v29  ;;  %vm2256_vm8 = vmand %vm2636_vm3, %vm2154_vm14  ;;  %vm2642_vm3 = vcmp.eq.s32.totalorder %v1730_v17, %v1763_v45  ;;  %v798_v13 = vsel %vm2645_vm9, %v436_v55, -1e+30  ;;  %v347_v9 = vmul.f32 2.0, %v300_v53 }
 0x11a   :  { %vm2272_vm12 = vmand %vm2642_vm3, %vm2190_vm2  ;;  %v342_v15 = vmul.f32 2.0, %v1070_v43  ;;  %vm2649_vm1 = vnez %v2577_v39  ;;  %vm2650_vm3 = vnez %v2519_v33  ;;  %vm2651_vm4 = vnez %v2521_v24  ;;  %v2653_v39 = vld [vmem:[#allocation22_spill] sm:$0xff] }
 0x11b   :  { %vm2648_vm14 = vmand %vm2646_vm7, %vm2647_vm0  ;;  %v803_v3 = vsel %vm2256_vm8, %v2212_v46, -1e+30  ;;  %v810_v31 = vmax.f32 %v794_v59, %v798_v13  ;;  %vm2654_vm0 = vcmp.eq.s32.totalorder %v1957_v35, 1  ;;  %v806_v24 = vsel %vm2272_vm12, %v444_v58, -1e+30  ;;  %v2658_v59 = vld [vmem:[#allocation14_spill] sm:$0xff] }
 0x11c   :  { %v835_v63 = vsel %vm2648_vm14, %v436_v55, 1e+30  ;;  %vm790_vm15 = vmand %vm2649_vm1, %vm2190_vm2  ;;  %vm530_vm14 = vcmp.eq.s32.totalorder %v2653_v39, %v1763_v45  ;;  %vm2655_vm2 = vcmp.ne.s32.totalorder %v1776_v48, %v1774_v47  ;;  %v350_v34 = vmul.f32 2.0, %v1082_v7  ;;  %v2662_v55 = vld [vmem:[#allocation24_spill] sm:$0xff] }
 0x11d   :  { %vm2652_vm5 = vmand %vm2650_vm3, %vm2651_vm4  ;;  %v847_v8 = vmin.f32 %v2108_v16, %v835_v63  ;;  %v2659_v16 = vld [vmem:[#allocation15_spill] sm:$0xff]  ;;  %v814_v35 = vmax.f32 %v810_v31, %v802_v10  ;;  %v843_v4 = vsel %vm790_vm15, %v444_v58, 1e+30  ;;  %v341_v53 = vmul.f32 2.0, %v270_v26  ;;  %v2679_v63 = vld [vmem:[#allocation16_spill] sm:$0xff] }
 0x11e   :  { %v2293_v17 = vsel %vm2652_vm5, %v2162_v52, 1e+30  ;;  %vm2306_vm4 = vmand %vm2655_vm2, %vm2654_vm0  ;;  %v435_v52 = vsub.f32 %v2658_v59, %v339_v42  ;;  %v438_v60 = vsub.f32 %v2659_v16, %v342_v15  ;;  %vm2661_vm5 = vnez %v2660_v50  ;;  %v2684_v31 = vld [vmem:[#allocation20_spill] sm:$0xff] }
 0x11f   :  { %vm783_vm8 = vmand %vm2661_vm5, %vm2631_vm13  ;;  %v851_v48 = vmin.f32 %v847_v8, %v839_v30  ;;  %vm2663_vm1 = vcmp.eq.s32.totalorder %v2662_v55, 1  ;;  %vm2664_vm9 = vcmp.ne.s32.totalorder %v1788_v2, %v1774_v47  ;;  %vm2667_vm7 = vnez %v2596_v14  ;;  %v2671_v30 = vld [vmem:[#allocation18_spill] sm:$0xff] }
 0x120   :  { %vm2323_vm12 = vmand %vm2664_vm9, %vm2663_vm1  ;;  %v797_v12 = vsel %vm2667_vm7, %v435_v52, -1e+30  ;;  %vm2668_vm3 = vnez %v2536_v5  ;;  %vm2669_vm0 = vnez %v2532_v57  ;;  %v443_v58 = vsub.f32 %v2671_v30, %v347_v9 }
 0x121   :  { %vm2670_vm2 = vmand %vm2668_vm3, %vm2669_vm0  ;;  %v349_v42 = vmul.f32 2.0, %v310_v62  ;;  %vm2672_vm15 = vcmp.eq.s32.totalorder %v1732_v18, %v1763_v45  ;;  %v818_v14 = vmax.f32 %v814_v35, %v806_v24  ;;  %v855_v43 = vmin.f32 %v851_v48, %v843_v4  ;;  %v867_v48 = vld [vmem:[#allocation2] sm:$0x1] }
 0x122   :  { %v834_v10 = vsel %vm2670_vm2, %v435_v52, 1e+30  ;;  %vm2340_vm1 = vmand %vm2672_vm15, %vm2306_vm4  ;;  %v809_v7 = vmax.f32 %v793_v22, %v797_v12  ;;  %vm2675_vm9 = vnez %v2609_v44  ;;  %vm2676_vm3 = vnez %v2613_v40 }
 0x123   :  { %v846_v5 = vmin.f32 %v2200_v11, %v834_v10  ;;  %vm789_vm7 = vmand %vm2675_vm9, %vm2306_vm4  ;;  %v800_v57 = vsel %vm2676_vm3, %v438_v60, -1e+30  ;;  %v446_v13 = vsub.f32 %v2678_v41, %v350_v34  ;;  %v437_v22 = vsub.f32 %v2679_v63, %v341_v53 }
 0x124   :  { %vm2677_vm0 = vmand %vm2614_vm6, %vm2610_vm10  ;;  %vm2680_vm2 = vcmp.eq.s32.totalorder %v1734_v19, %v1763_v45  ;;  %v813_v40 = vmax.f32 %v809_v7, %v801_v37  ;;  %v812_v6 = vmax.f32 %v796_v21, %v800_v57  ;;  %v805_v9 = vsel %vm2340_vm1, %v443_v58, -1e+30 }
 0x125   :  { %v837_v18 = vsel %vm2677_vm0, %v438_v60, 1e+30  ;;  %vm2363_vm15 = vmand %vm2680_vm2, %vm2323_vm12  ;;  %v850_v11 = vmin.f32 %v846_v5, %v838_v1  ;;  %v842_v15 = vsel %vm789_vm7, %v443_v58, 1e+30  ;;  %vm2683_vm6 = vnez %v2634_v29  ;;  %v876_v58 = vld [vmem:[%s2442_s2] sm:$0x1] }
 0x126   :  { %v849_v27 = vmin.f32 %v2228_v61, %v837_v18  ;;  %vm792_vm10 = vmand %vm2238_vm11, %vm2323_vm12  ;;  %v799_v19 = vsel %vm2683_vm6, %v437_v22, -1e+30  ;;  %v445_v8 = vsub.f32 %v2684_v31, %v349_v42  ;;  %vm2685_vm4 = vcmp.eq.s32.totalorder %v2097_v20, 1  ;;  %s1221_s2 = smov [#allocation9]  }
 0x127   :  { %vm2686_vm9 = vcmp.ne.s32.totalorder %v2641_v51, %v1774_v47  ;;  %v817_v1 = vmax.f32 %v813_v40, %v805_v9  ;;  %v854_v21 = vmin.f32 %v850_v11, %v842_v15  ;;  %v816_v61 = vmax.f32 %v812_v6, %v804_v25  ;;  %s942_s19 = sshll.u32 %s1221_s2, 4  ;;  %s943_s19 = int_to_ptr.vmem [resolvable:$true] %s942_s19 }
 0x128   :  { %vm2382_vm3 = vmand %vm2686_vm9, %vm2685_vm4  ;;  %v853_v0 = vmin.f32 %v849_v27, %v841_v38  ;;  %vm2690_vm12 = vmmov 1   ;;  %vm2691_vm1 = vcmp.eq.s32.totalorder %v2635_v54, %v1763_v45  ;;  %v808_v20 = vsel %vm2363_vm15, %v446_v13, -1e+30 }
 0x129   :  { %vm771_vm7 = vmxor %vm2691_vm1, %vm2690_vm12  ;;  %v845_v47 = vsel %vm792_vm10, %v446_v13, 1e+30  ;;  %v811_v29 = vmax.f32 %v795_v56, %v799_v19  ;;  %v836_v49 = vsel %vm783_vm8, %v437_v22, 1e+30  ;;  %vm2692_vm0 = vnez %v2605_v36 }
 0x12a   :  { %vm787_vm2 = vmand %vm771_vm7, %vm2692_vm0  ;;  %v821_v32 = vmax.f32 %v817_v1, %v818_v14  ;;  %v858_v25 = vmin.f32 %v854_v21, %v855_v43  ;;  %v820_v38 = vmax.f32 %v816_v61, %v808_v20  ;;  %v857_v51 = vmin.f32 %v853_v0, %v845_v47 }
 0x12b   :  { %vm759_vm15 = vmand %vm530_vm14, %vm2382_vm3  ;;  %v848_v54 = vmin.f32 %v2293_v17, %v836_v49  ;;  %v815_v56 = vmax.f32 %v811_v29, %v803_v3  ;;  %v840_v28 = vsel %vm787_vm2, %v2212_v46, 1e+30 }
 0x12c   :  { %vm775_vm13 = vmxor %vm530_vm14, %vm2690_vm12  ;;  %v807_v36 = vsel %vm759_vm15, %v445_v8, -1e+30 }
 0x12d   :  { %vm791_vm5 = vmand %vm775_vm13, %vm2382_vm3  ;;  %v819_v26 = vmax.f32 %v815_v56, %v807_v36  ;;  %v852_v62 = vmin.f32 %v848_v54, %v840_v28 }
 0x12e   :  { %v844_v33 = vsel %vm791_vm5, %v445_v8, 1e+30 }
 0x12f   :  { %v822_v24 = vmax.f32 %v819_v26, %v820_v38  ;;  %v856_v59 = vmin.f32 %v852_v62, %v844_v33 }
 0x131   :  { %v823_v52 = vmax.f32 %v821_v32, %v822_v24  ;;  %v859_v16 = vmin.f32 %v856_v59, %v857_v51 }
 0x133   :  { %v824_v17 = vrot.slane %v823_v52, 4  ;;  %v860_v3 = vmin.f32 %v858_v25, %v859_v16 }
 0x135   :  { %v825_v60 = vmax.f32 %v823_v52, %v824_v17  ;;  %v861_v34 = vrot.slane %v860_v3, 4 }
 0x137   :  { %v826_v50 = vrot.slane %v825_v60, 2  ;;  %v862_v45 = vmin.f32 %v860_v3, %v861_v34 }
 0x139   :  { %v827_v39 = vmax.f32 %v825_v60, %v826_v50  ;;  %v863_v35 = vrot.slane %v862_v45, 2 }
 0x13b   :  { %v828_v46 = vrot.slane %v827_v39, 1  ;;  %v864_v4 = vmin.f32 %v862_v45, %v863_v35 }
 0x13d   :  { %v829_v53 = vmax.f32 %v827_v39, %v828_v46  ;;  %v865_v55 = vrot.slane %v864_v4, 1 }
 0x13f   :  { %v866_v12 = vmin.f32 %v864_v4, %v865_v55  ;;  %v868_v10 = vmax.f32 %v867_v48, %v829_v53 }
 0x141   :  { %869 = vst [vmem:[#allocation2] sm:$0x1] %v868_v10  ;;  %v871_v30 = vmin.f32 %v870_v23, %v866_v12 }
 0x143   :  { %872 = vst [vmem:[#allocation3] sm:$0x1] %v871_v30 }
 0x148   :  { %v877_v42 = vld [vmem:[#allocation2] sm:$0x1] }
 0x149   :  { %v878_v2 = vadd.f32 %v877_v42, %v876_v58 }
 0x14a   :  { %v887_v14 = vld [vmem:[#allocation3] sm:$0x1] }
 0x14b   :  { %v879_v43 = vmax.f32 %v878_v2, 1e-12  ;;  %v888_v7 = vadd.f32 %v887_v14, %v876_v58 }
 0x14d   :  { %1125 = vrsqrt.f32 %v879_v43  ;;  %v889_v5 = vmax.f32 %v888_v7, 1e-12  ;;  %vm882_vm14 = vcmp.eq.f32.partialorder %v879_v43, inf  ;;  %v885_v41 = vand.u32 2147483648, %v879_v43 }
 0x14e   :  { %vm884_vm8 = vcmp.eq.f32.partialorder %v879_v43, 0.0 }
 0x14f   :  { %1127 = vrsqrt.f32 %v889_v5  ;;  %vm892_vm10 = vcmp.eq.f32.partialorder %v889_v5, inf  ;;  %v895_v40 = vand.u32 2147483648, %v889_v5 }
 0x15a   :  { %v1126_v57 = vpop.eup %1125 }
 0x15b   :  { %v881_v18 = vmul.f32 %v1126_v57, %v879_v43 }
 0x15c   :  { %v1128_v13 = vpop.eup %1127 }
 0x15d   :  { %v883_v63 = vsel %vm882_vm14, %v879_v43, %v881_v18  ;;  %v891_v44 = vmul.f32 %v1128_v13, %v889_v5 }
 0x15e   :  { %v886_v22 = vsel %vm884_vm8, %v885_v41, %v883_v63 }
 0x15f   :  { %897 = vst [vmem:[#allocation6] sm:$0x1] %v886_v22 }
 0x160   :  { %1140 = shalt.err (!%p1137_p4)
}
 0x161   :  { %925 = dma.vmem_to_hbm [thread:$0]  %s923_s16, 16, %s2450_s10, [#allocation7]   ;;  %v893_v11 = vsel %vm892_vm10, %v889_v5, %v891_v44  ;;  %vm894_vm6 = vcmp.eq.f32.partialorder %v889_v5, 0.0 }
 0x162   :  { %v896_v6 = vsel %vm894_vm6, %v895_v40, %v893_v11  ;;  %s1222_s3 = smov [#allocation4]   ;;  %s1149_s25 = scalar_lea.vmem %s2419_s18, 16 }
 0x163   :  { %s912_s24 = sshll.u32 %s1222_s3, 4  ;;  %v899_v27 = vsub.f32 %v886_v22, %v896_v6  ;;  %898 = vst [vmem:[#allocation8] sm:$0x1] %v896_v6  ;;  %vm903_vm4 = vcmp.gt.f32.partialorder %v896_v6, %v886_v22  ;;  %p1150_p5 = scmp.ne.s32.totalorder %s2419_s18, %s1149_s25  ;;  %s913_s24 = int_to_ptr.vmem [resolvable:$true] %s912_s24 }
 0x164   :  { %s1153_s26 = scalar_lea.vmem %s2419_s18, 32  ;;  %p1154_p6 = scmp.lt.s32.totalorder %s2419_s18, %s2419_s18 }
 0x165   :  { %p1155_p7 = scmp.lt.s32.totalorder %s1153_s26, %s1149_s25 }
 0x167   :  { %p1156_p8 = por %p1155_p7, %p1154_p6 }
 0x169   :  { %p1157_p9 = pnand %p1156_p8, %p1150_p5 }
 0x16b   :  { %1160 = shalt.err (!%p1157_p9)
}
 0x16c   :  { %935 = dma.vmem_to_hbm [thread:$0]  %s2419_s18, 16, %s2451_s11, [#allocation7]   ;;  %v2693_v9 = vmov 0   ;;  %v901_v19 = vmax.f32 %v899_v27, 0.0 }
 0x16d   :  { %v904_v15 = vsel %vm903_vm4, 1, %v2693_v9  ;;  %s1169_s0 = scalar_lea.vmem %s943_s19, 16  ;;  %s1173_s28 = scalar_lea.vmem %s943_s19, 32 }
 0x16e   :  { %905 = vst [vmem:[#allocation9] sm:$0x1] %v904_v15  ;;  %p1170_p10 = scmp.ne.s32.totalorder %s943_s19, %s1169_s0  ;;  %p1174_p11 = scmp.lt.s32.totalorder %s943_s19, %s943_s19 }
 0x16f   :  { %p1175_p12 = scmp.lt.s32.totalorder %s1173_s28, %s1169_s0 }
 0x171   :  { %p1176_p13 = por %p1175_p12, %p1174_p11 }
 0x173   :  { %p1177_p0 = pnand %p1176_p13, %p1170_p10 }
 0x175   :  { %1180 = shalt.err (!%p1177_p0)
}
 0x176   :  { %945 = dma.vmem_to_hbm [thread:$0]  %s943_s19, 16, %s2452_s12, [#allocation10]   ;;  %902 = vst [vmem:[#allocation4] sm:$0x1] %v901_v19 }
 0x177   :  { %s1189_s13 = scalar_lea.vmem %s913_s24, 16  ;;  %s1193_s11 = scalar_lea.vmem %s913_s24, 32 }
 0x178   :  { %p1190_p1 = scmp.ne.s32.totalorder %s913_s24, %s1189_s13  ;;  %p1194_p2 = scmp.lt.s32.totalorder %s913_s24, %s913_s24 }
 0x179   :  { %p1195_p3 = scmp.lt.s32.totalorder %s1193_s11, %s1189_s13 }
 0x17b   :  { %p1196_p4 = por %p1195_p3, %p1194_p2 }
 0x17d   :  { %p1197_p5 = pnand %p1196_p4, %p1190_p1 }
 0x17f   :  { %1200 = shalt.err (!%p1197_p5)
}
 0x180   :  { %915 = dma.vmem_to_hbm [thread:$0]  %s913_s24, 16, %s2449_s9, [#allocation5]  }
 0x181   :  { %1209 = dma.done.wait [#allocation5], 16  }
 0x182   :  { %1210 = vsyncadd [#allocation5], 4294967280 }
 0x183   :  { %1211 = dma.done.wait [#allocation7], 32  }
 0x184   :  { %1212 = vsyncadd [#allocation7], 4294967264 }
 0x185   :  { %1213 = dma.done.wait [#allocation10], 16  }
 0x186   :  { %1214 = vsyncadd [#allocation10], 4294967280 }
 0x187   :  { %958 = vsyncpa [#allocation5], 1 }
 0x188   :  { %959 = vsyncpa [#allocation7], 1 }
 0x189   :  { %960 = vsyncpa [#allocation10], 1 }

</bundles_post_ra>
